<compile_context>
chip_gen: v7x
topology: tpu7x:2x2x1
jax: 0.10.0
libtpu: 0.0.40
codegen_flags: <defaults>
</compile_context>

<pallas_src>
import math
import functools

import numpy as np
import jax
import jax.numpy as jnp
from jax.experimental import pallas as pl
from jax.experimental.pallas import tpu as pltpu


LANE = 128
SUBLANE_BF16 = 16       # bf16 packs 16 rows per vreg


def _round_up(x, m):
    return (x + m - 1) // m * m


# ----------------------------------------------------------------------------
# Pallas kernel: full encoder stack (L layers + final LayerNorm) in one call.
# ----------------------------------------------------------------------------
def _encoder_stack_kernel(x_ref, segc_ref, segr_ref,
                          wqkv_ref, bqkv_ref, wo_ref, bo_ref,
                          w1_ref, b1_ref, w2_ref, b2_ref,
                          g1_ref, be1_ref, g2_ref, be2_ref,
                          gf_ref, bfin_ref,
                          out_ref,
                          mask_ref,
                          *, nhead, head_dim, d_real, eps):
    li = pl.program_id(0)
    n_layers = pl.num_programs(0)

    # Layer 0: load the (padded) source activation into the resident output block
    # and build the additive segment mask ONCE into VMEM scratch.
    @pl.when(li == 0)
    def _():
        out_ref[...] = x_ref[...]
        same = segc_ref[...] == segr_ref[...]           # (Sp, Sp) bool
        mask_ref[...] = jnp.where(same, 0.0, -1e9)      # additive f32 mask

    x = out_ref[...]                                    # (Sp, Dp) f32, VMEM-resident
    sp, dp = x.shape
    xb = x.astype(jnp.bfloat16)                         # cast once per layer
    amask = mask_ref[...]                               # (Sp, Sp) f32

    # Mask of real (non-padded) feature columns, for exact LayerNorm statistics.
    col = jax.lax.broadcasted_iota(jnp.int32, (1, dp), 1)
    fmask = (col < d_real).astype(jnp.float32)          # (1, Dp)
    inv_d = 1.0 / float(d_real)

    def layernorm(y, g, b):
        # padded feature columns of y are exactly zero by construction
        mu = jnp.sum(y, axis=-1, keepdims=True) * inv_d
        diff = (y - mu) * fmask
        var = jnp.sum(diff * diff, axis=-1, keepdims=True) * inv_d
        return diff * jax.lax.rsqrt(var + eps) * g + b

    # ---- self attention -----------------------------------------------------
    # Fused, densely packed QKV projection (1/sqrt(hd) already folded into Q).
    qkv = jnp.dot(xb, wqkv_ref[...], preferred_element_type=jnp.float32) + bqkv_ref[...]
    qkvb = qkv.astype(jnp.bfloat16)                     # cast once, slice per head

    dm = nhead * head_dim                               # = d_model
    dims_qkt = (((1,), (1,)), ((), ()))                 # q @ k^T without explicit .T

    heads = []
    for h in range(nhead):                              # static unroll, 8-lane sub-slices
        qh = qkvb[:, h * head_dim:(h + 1) * head_dim]
        kh = qkvb[:, dm + h * head_dim: dm + (h + 1) * head_dim]
        vh = qkvb[:, 2 * dm + h * head_dim: 2 * dm + (h + 1) * head_dim]

        s = jax.lax.dot_general(qh, kh, dims_qkt,
                                preferred_element_type=jnp.float32) + amask
        s = s - jnp.max(s, axis=-1, keepdims=True)
        p = jnp.exp(s)
        p = p * pl.reciprocal(jnp.sum(p, axis=-1, keepdims=True), approx=True)
        heads.append(jnp.dot(p.astype(jnp.bfloat16), vh,
                             preferred_element_type=jnp.float32))   # (Sp, hd)

    # Single fused output projection: lane-concatenate heads -> one matmul vs wo.
    attn_cat = jnp.concatenate(heads, axis=-1) if nhead > 1 else heads[0]  # (Sp, dm)
    hr = wo_ref.shape[0]
    if hr > dm:   # static padding to the packed wo row count (bf16 sublane multiple)
        attn_cat = jnp.concatenate(
            [attn_cat, jnp.zeros((sp, hr - dm), jnp.float32)], axis=-1)
    attn = jnp.dot(attn_cat.astype(jnp.bfloat16), wo_ref[...],
                   preferred_element_type=jnp.float32) + bo_ref[...]

    # ---- residual + LayerNorm1 (norm_first=False) ---------------------------
    y = layernorm(x + attn, g1_ref[...], be1_ref[...])

    # ---- feed-forward: linear2(relu(linear1(y))) -----------------------------
    yb = y.astype(jnp.bfloat16)
    h1 = jnp.dot(yb, w1_ref[...], preferred_element_type=jnp.float32) + b1_ref[...]
    h1 = jnp.maximum(h1, 0.0)
    ff = jnp.dot(h1.astype(jnp.bfloat16), w2_ref[...],
                 preferred_element_type=jnp.float32) + b2_ref[...]

    # ---- residual + LayerNorm2 ----------------------------------------------
    out_ref[...] = layernorm(y + ff, g2_ref[...], be2_ref[...])

    # ---- final LayerNorm (self.norm), fused into the last layer iteration ----
    @pl.when(li == n_layers - 1)
    def _():
        out_ref[...] = layernorm(out_ref[...], gf_ref[...], bfin_ref[...])


def _stacked_spec(shape):
    """BlockSpec for a (L, ...) stacked parameter: pick layer li, squeeze it."""
    nrest = len(shape) - 1
    return pl.BlockSpec((None,) + tuple(shape[1:]),
                        lambda li, _n=nrest: (li,) + (0,) * _n)


def _full_spec(shape):
    """BlockSpec covering the whole array, same block every layer iteration."""
    ndim = len(shape)
    return pl.BlockSpec(tuple(shape), lambda li, _n=ndim: (0,) * _n)


# ----------------------------------------------------------------------------
# Glue: lattice geometry (mirrors compute_lattice_distances_for_cuda)
# ----------------------------------------------------------------------------
def det_3x3(m):
    return (m[:, 0, 0] * m[:, 1, 1] * m[:, 2, 2]
            + m[:, 0, 1] * m[:, 1, 2] * m[:, 2, 0]
            + m[:, 0, 2] * m[:, 1, 0] * m[:, 2, 1]
            - m[:, 0, 2] * m[:, 1, 1] * m[:, 2, 0]
            - m[:, 0, 0] * m[:, 1, 2] * m[:, 2, 1]
            - m[:, 0, 1] * m[:, 1, 0] * m[:, 2, 2])


def get_edge_index(sizes):
    ei, ej = [], []
    cur = 0
    for n in sizes:
        idx = np.arange(cur, cur + n)
        ei.append(np.repeat(idx, n))
        ej.append(np.tile(idx, n))
        cur += n
    return jnp.asarray(np.stack([np.concatenate(ei), np.concatenate(ej)]),
                       dtype=jnp.int32)


def compute_lattice_distances(pos, batch, trans, sizes):
    edges = get_edge_index(sizes)
    vcell = det_3x3(trans)
    recip = jnp.stack([jnp.cross(trans[:, 1], trans[:, 2]),
                       jnp.cross(trans[:, 2], trans[:, 0]),
                       jnp.cross(trans[:, 0], trans[:, 1])], axis=1) \
        * (2.0 * math.pi / vcell[:, None, None])
    pos_p_q = pos[edges[1]] - pos[edges[0]]
    b2e = batch[edges[0]]
    kr_base = jnp.einsum('eij,ej->ei', recip[b2e], pos_p_q)
    return pos_p_q, kr_base, recip, vcell, edges


# ----------------------------------------------------------------------------
# Parameters: real-sized init (xavier_uniform weights, zero biases) + packing
# into the padded / stacked / bf16 layout the kernel consumes.
# ----------------------------------------------------------------------------
def _xavier(key, fan_in, fan_out):
    bound = math.sqrt(6.0 / (fan_in + fan_out))
    return jax.random.uniform(key, (fan_in, fan_out), jnp.float32, -bound, bound)


def init_encoder_params(key, num_layers, d_model, dim_ff):
    layers = []
    for _ in range(num_layers):
        ks = jax.random.split(key, 8)
        key = ks[-1]
        layers.append(dict(
            wq=_xavier(ks[0], d_model, d_model), bq=jnp.zeros((d_model,), jnp.float32),
            wk=_xavier(ks[1], d_model, d_model), bk=jnp.zeros((d_model,), jnp.float32),
            wv=_xavier(ks[2], d_model, d_model), bv=jnp.zeros((d_model,), jnp.float32),
            wo=_xavier(ks[3], d_model, d_model), bo=jnp.zeros((d_model,), jnp.float32),
            w1=_xavier(ks[4], d_model, dim_ff), b1=jnp.zeros((dim_ff,), jnp.float32),
            w2=_xavier(ks[5], dim_ff, d_model), b2=jnp.zeros((d_model,), jnp.float32),
            g1=jnp.ones((d_model,), jnp.float32), be1=jnp.zeros((d_model,), jnp.float32),
            g2=jnp.ones((d_model,), jnp.float32), be2=jnp.zeros((d_model,), jnp.float32),
        ))
    final = dict(g=jnp.ones((d_model,), jnp.float32),
                 b=jnp.zeros((d_model,), jnp.float32))
    return layers, final


def pack_encoder_params(layers, final, *, d_model, dim_ff, nhead):
    """Pack per-layer params into stacked, lane-padded, bf16 (weights) arrays.

    Dense head packing (no per-head padding):
      * residual stream padded d_model -> Dp = round_up(d_model, 128) (trailing
        zeros; LN gammas / all weight pad columns / biases zero-padded so padded
        feature columns stay exactly 0)
      * fused QKV weight: (L, Dp, CP) with CP = round_up(3*d_model, 128); Q columns
        (and Q bias) carry the folded 1/sqrt(head_dim) scale.
      * output projection: (L, HR, Dp) with HR = round_up(d_model, 16).
    """
    num_layers = len(layers)
    hd = d_model // nhead
    dp = _round_up(d_model, LANE)
    fp = _round_up(dim_ff, LANE)
    cp = _round_up(3 * d_model, LANE)
    hr = _round_up(d_model, SUBLANE_BF16)
    scale = 1.0 / math.sqrt(hd)

    wqkv = np.zeros((num_layers, dp, cp), np.float32)
    bqkv = np.zeros((num_layers, 1, cp), np.float32)
    wo = np.zeros((num_layers, hr, dp), np.float32)
    bo = np.zeros((num_layers, 1, dp), np.float32)
    w1 = np.zeros((num_layers, dp, fp), np.float32)
    b1 = np.zeros((num_layers, 1, fp), np.float32)
    w2 = np.zeros((num_layers, fp, dp), np.float32)
    b2 = np.zeros((num_layers, 1, dp), np.float32)
    g1 = np.zeros((num_layers, 1, dp), np.float32)
    be1 = np.zeros((num_layers, 1, dp), np.float32)
    g2 = np.zeros((num_layers, 1, dp), np.float32)
    be2 = np.zeros((num_layers, 1, dp), np.float32)

    for li, p in enumerate(layers):
        wqkv[li, :d_model, 0:d_model] = np.asarray(p['wq']) * scale        # Q (scaled)
        wqkv[li, :d_model, d_model:2 * d_model] = np.asarray(p['wk'])      # K
        wqkv[li, :d_model, 2 * d_model:3 * d_model] = np.asarray(p['wv'])  # V
        bqkv[li, 0, 0:d_model] = np.asarray(p['bq']) * scale
        bqkv[li, 0, d_model:2 * d_model] = np.asarray(p['bk'])
        bqkv[li, 0, 2 * d_model:3 * d_model] = np.asarray(p['bv'])
        wo[li, :d_model, :d_model] = np.asarray(p['wo'])
        bo[li, 0, :d_model] = np.asarray(p['bo'])
        w1[li, :d_model, :dim_ff] = np.asarray(p['w1'])
        b1[li, 0, :dim_ff] = np.asarray(p['b1'])
        w2[li, :dim_ff, :d_model] = np.asarray(p['w2'])
        b2[li, 0, :d_model] = np.asarray(p['b2'])
        g1[li, 0, :d_model] = np.asarray(p['g1'])
        be1[li, 0, :d_model] = np.asarray(p['be1'])
        g2[li, 0, :d_model] = np.asarray(p['g2'])
        be2[li, 0, :d_model] = np.asarray(p['be2'])

    gf = np.zeros((1, dp), np.float32)
    bfin = np.zeros((1, dp), np.float32)
    gf[0, :d_model] = np.asarray(final['g'])
    bfin[0, :d_model] = np.asarray(final['b'])

    return dict(
        wqkv=jnp.asarray(wqkv, jnp.bfloat16), bqkv=jnp.asarray(bqkv),
        wo=jnp.asarray(wo, jnp.bfloat16), bo=jnp.asarray(bo),
        w1=jnp.asarray(w1, jnp.bfloat16), b1=jnp.asarray(b1),
        w2=jnp.asarray(w2, jnp.bfloat16), b2=jnp.asarray(b2),
        g1=jnp.asarray(g1), be1=jnp.asarray(be1),
        g2=jnp.asarray(g2), be2=jnp.asarray(be2),
        gf=jnp.asarray(gf), bf=jnp.asarray(bfin),
        num_layers=num_layers, d_model=d_model, dim_ff=dim_ff, nhead=nhead,
        dp=dp, fp=fp, cp=cp, hr=hr, head_dim=hd,
    )


# ----------------------------------------------------------------------------
# Full encoder forward (mirrors CrystalformerEncoderCUDA.forward)
# ----------------------------------------------------------------------------
def crystalformer_encoder_forward(src, pos, batch, trans, sizes, packed, *, eps=1e-5):
    batch = batch - batch[0]

    # Lattice geometry kept to mirror the reference dataflow (unused by the
    # simplified attention core, see TODO at the top of the file).
    _pos_ij, _kr_base, _rvecs, _vcell, _edges = compute_lattice_distances(
        pos, batch, trans, sizes)

    s_len, d_model = src.shape
    assert d_model == packed['d_model']
    num_layers = packed['num_layers']
    dp, nhead = packed['dp'], packed['nhead']
    sp = _round_up(s_len, SUBLANE_BF16)
    num_graphs = len(sizes)

    # Pad activations to (Sp, Dp); padded rows get a fresh segment id so they
    # only attend among themselves and never touch real tokens.
    x_p = jnp.zeros((sp, dp), jnp.float32).at[:s_len, :d_model].set(src)
    seg = jnp.full((sp,), num_graphs, jnp.int32).at[:s_len].set(batch.astype(jnp.int32))
    seg_col = seg[:, None]                      # (Sp, 1)
    seg_row = seg[None, :]                      # (1, Sp)

    ins = (x_p, seg_col, seg_row,
           packed['wqkv'], packed['bqkv'], packed['wo'], packed['bo'],
           packed['w1'], packed['b1'], packed['w2'], packed['b2'],
           packed['g1'], packed['be1'], packed['g2'], packed['be2'],
           packed['gf'], packed['bf'])

    in_specs = [_full_spec(x_p.shape), _full_spec(seg_col.shape), _full_spec(seg_row.shape)]
    in_specs += [_stacked_spec(packed[k].shape) for k in
                 ('wqkv', 'bqkv', 'wo', 'bo', 'w1', 'b1', 'w2', 'b2',
                  'g1', 'be1', 'g2', 'be2')]
    in_specs += [_full_spec(packed['gf'].shape), _full_spec(packed['bf'].shape)]

    kernel = functools.partial(
        _encoder_stack_kernel,
        nhead=nhead, head_dim=packed['head_dim'], d_real=d_model, eps=eps)

    out_p = pl.pallas_call(
        kernel,
        out_shape=jax.ShapeDtypeStruct((sp, dp), jnp.float32),
        grid=(num_layers,),
        in_specs=in_specs,
        out_specs=pl.BlockSpec((sp, dp), lambda li: (0, 0)),
        scratch_shapes=[pltpu.VMEM((sp, sp), jnp.float32)],   # additive segment mask
        input_output_aliases={0: 0},                          # donate x_p buffer (P8)
        compiler_params=pltpu.CompilerParams(
            dimension_semantics=("arbitrary",),               # layers are sequential
            # NOTE: 32 MiB is already half of v7x's 64 MiB physical VMEM;
            # re-derive when adding flash-style query tiling for long sequences.
            vmem_limit_bytes=32 * 1024 * 1024),
    )(*ins)

    return out_p[:s_len, :d_model]


# ----------------------------------------------------------------------------
# Pure-JAX reference (for correctness).  Weights go through the same bf16
# quantization the kernel stores them in; activation math stays f32.
# ----------------------------------------------------------------------------
def encoder_reference(src, seg, layers, final, *, nhead, eps=1e-5):
    def qtz(w):
        return w.astype(jnp.bfloat16).astype(jnp.float32)

    def ln(y, g, b):
        mu = jnp.mean(y, axis=-1, keepdims=True)
        var = jnp.mean((y - mu) ** 2, axis=-1, keepdims=True)
        return (y - mu) * jax.lax.rsqrt(var + eps) * g + b

    s_len, d_model = src.shape
    hd = d_model // nhead
    mask = seg[:, None] == seg[None, :]

    x = src
    for p in layers:
        q = x @ qtz(p['wq']) + p['bq']
        k = x @ qtz(p['wk']) + p['bk']
        v = x @ qtz(p['wv']) + p['bv']
        heads = []
        for h in range(nhead):
            sl = slice(h * hd, (h + 1) * hd)
            s = (q[:, sl] @ k[:, sl].T) / math.sqrt(hd)
            s = jnp.where(mask, s, -1e9)
            a = jax.nn.softmax(s, axis=-1)
            heads.append(a @ v[:, sl])
        attn = jnp.concatenate(heads, axis=-1) @ qtz(p['wo']) + p['bo']
        y = ln(x + attn, p['g1'], p['be1'])
        ff = jnp.maximum(y @ qtz(p['w1']) + p['b1'], 0.0) @ qtz(p['w2']) + p['b2']
        x = ln(y + ff, p['g2'], p['be2'])
    return ln(x, final['g'], final['b'])


# ----------------------------------------------------------------------------
# Demo
# ----------------------------------------------------------------------------
if __name__ == "__main__":
    key = jax.random.PRNGKey(0)
    d_model = 32
    nhead = 4
    num_layers = 2
    dim_ff = 64

    sizes = [3, 5]                 # two crystals
    S = sum(sizes)                 # total number of atoms (sequence length)

    k_src, k_pos, k_trans, k_par = jax.random.split(key, 4)
    src = jax.random.normal(k_src, (S, d_model), dtype=jnp.float32)
    pos = jax.random.uniform(k_pos, (S, 3), dtype=jnp.float32) * 4.0
    batch = jnp.asarray(np.repeat(np.arange(len(sizes)), sizes), dtype=jnp.int32)
    trans = jnp.stack([jnp.eye(3, dtype=jnp.float32) * 3.0,
                       jnp.eye(3, dtype=jnp.float32) * 4.0]) \
        + 0.05 * jax.random.normal(k_trans, (len(sizes), 3, 3), dtype=jnp.float32)

    layers_real, final_real = init_encoder_params(k_par, num_layers, d_model, dim_ff)
    packed = pack_encoder_params(layers_real, final_real,
                                 d_model=d_model, dim_ff=dim_ff, nhead=nhead)

    out = crystalformer_encoder_forward(src, pos, batch, trans, sizes, packed)
    out = jax.block_until_ready(out)
    assert out.shape == (S, d_model)
    assert bool(jnp.all(jnp.isfinite(out)))

    ref = encoder_reference(src, batch - batch[0], layers_real, final_real, nhead=nhead)
    np.testing.assert_allclose(np.asarray(out), np.asarray(ref), rtol=5e-2, atol=5e-2)

    print("KERNEL_OK")
</pallas_src>

<mosaic_0001>
module attributes {stable_mosaic.version = 11 : i64} {
  func.func @_encoder_stack_kernel(%arg0: i32, %arg1: memref<16x128xf32, #tpu.memory_space<vmem>>, %arg2: memref<16x1xi32, #tpu.memory_space<vmem>>, %arg3: memref<1x16xi32, #tpu.memory_space<vmem>>, %arg4: memref<1x128x128xbf16, #tpu.memory_space<vmem>>, %arg5: memref<1x1x128xf32, #tpu.memory_space<vmem>>, %arg6: memref<1x32x128xbf16, #tpu.memory_space<vmem>>, %arg7: memref<1x1x128xf32, #tpu.memory_space<vmem>>, %arg8: memref<1x128x128xbf16, #tpu.memory_space<vmem>>, %arg9: memref<1x1x128xf32, #tpu.memory_space<vmem>>, %arg10: memref<1x128x128xbf16, #tpu.memory_space<vmem>>, %arg11: memref<1x1x128xf32, #tpu.memory_space<vmem>>, %arg12: memref<1x1x128xf32, #tpu.memory_space<vmem>>, %arg13: memref<1x1x128xf32, #tpu.memory_space<vmem>>, %arg14: memref<1x1x128xf32, #tpu.memory_space<vmem>>, %arg15: memref<1x1x128xf32, #tpu.memory_space<vmem>>, %arg16: memref<1x128xf32, #tpu.memory_space<vmem>>, %arg17: memref<1x128xf32, #tpu.memory_space<vmem>>, %arg18: memref<16x128xf32, #tpu.memory_space<vmem>>, %arg19: memref<16x16xf32, #tpu.memory_space<vmem>>) attributes {dimension_semantics = [#tpu.dimension_semantics<arbitrary>], iteration_bounds = array<i64: 2>, scalar_prefetch = 0 : i64, scratch_operands = 1 : i64, tpu.core_type = #tpu.core_type<tc>, window_params = [{pipeline_mode = #tpu.pipeline_mode<synchronous>, transform_indices = @transform_0, window_bounds = array<i64: 16, 128>}, {pipeline_mode = #tpu.pipeline_mode<synchronous>, transform_indices = @transform_1, window_bounds = array<i64: 16, 1>}, {pipeline_mode = #tpu.pipeline_mode<synchronous>, transform_indices = @transform_2, window_bounds = array<i64: 1, 16>}, {transform_indices = @transform_3, window_bounds = array<i64: 1, 128, 128>}, {transform_indices = @transform_4, window_bounds = array<i64: 1, 1, 128>}, {transform_indices = @transform_5, window_bounds = array<i64: 1, 32, 128>}, {transform_indices = @transform_6, window_bounds = array<i64: 1, 1, 128>}, {transform_indices = @transform_7, window_bounds = array<i64: 1, 128, 128>}, {transform_indices = @transform_8, window_bounds = array<i64: 1, 1, 128>}, {transform_indices = @transform_9, window_bounds = array<i64: 1, 128, 128>}, {transform_indices = @transform_10, window_bounds = array<i64: 1, 1, 128>}, {transform_indices = @transform_11, window_bounds = array<i64: 1, 1, 128>}, {transform_indices = @transform_12, window_bounds = array<i64: 1, 1, 128>}, {transform_indices = @transform_13, window_bounds = array<i64: 1, 1, 128>}, {transform_indices = @transform_14, window_bounds = array<i64: 1, 1, 128>}, {pipeline_mode = #tpu.pipeline_mode<synchronous>, transform_indices = @transform_15, window_bounds = array<i64: 1, 128>}, {pipeline_mode = #tpu.pipeline_mode<synchronous>, transform_indices = @transform_16, window_bounds = array<i64: 1, 128>}, {pipeline_mode = #tpu.pipeline_mode<synchronous>, transform_indices = @transform_17, window_bounds = array<i64: 16, 128>}]} {
    %c0_i32 = arith.constant 0 : i32
    %0 = arith.cmpi eq, %arg0, %c0_i32 : i32
    %1 = arith.extui %0 : i1 to i32
    %c0_i32_0 = arith.constant 0 : i32
    %2 = arith.cmpi ne, %1, %c0_i32_0 : i32
    scf.if %2 {
      %c0_73 = arith.constant 0 : index
      %c0_74 = arith.constant 0 : index
      %172 = vector.load %arg1[%c0_73, %c0_74] : memref<16x128xf32, #tpu.memory_space<vmem>>, vector<16x128xf32>
      %c0_75 = arith.constant 0 : index
      %c0_76 = arith.constant 0 : index
      %173 = vector.load %arg18[%c0_75, %c0_76] : memref<16x128xf32, #tpu.memory_space<vmem>>, vector<16x128xf32>
      tpu.vector_store %arg18[%c0_75, %c0_76], %172 {strides = array<i32>} : memref<16x128xf32, #tpu.memory_space<vmem>>, vector<16x128xf32>,
      %c0_77 = arith.constant 0 : index
      %c0_78 = arith.constant 0 : index
      %174 = vector.load %arg2[%c0_77, %c0_78] : memref<16x1xi32, #tpu.memory_space<vmem>>, vector<16x1xi32>
      %c0_79 = arith.constant 0 : index
      %c0_80 = arith.constant 0 : index
      %175 = vector.load %arg3[%c0_79, %c0_80] : memref<1x16xi32, #tpu.memory_space<vmem>>, vector<1x16xi32>
      %176 = vector.broadcast %174 : vector<16x1xi32> to vector<16x16xi32>
      %177 = vector.broadcast %175 : vector<1x16xi32> to vector<16x16xi32>
      %178 = arith.cmpi eq, %176, %177 : vector<16x16xi32>
      %cst_81 = arith.constant 0.000000e+00 : f32
      %cst_82 = arith.constant -1.000000e+09 : f32
      %179 = vector.broadcast %cst_81 : f32 to vector<16x16xf32>
      %180 = vector.broadcast %cst_82 : f32 to vector<16x16xf32>
      %181 = arith.select %178, %179, %180 : vector<16x16xi1>, vector<16x16xf32>
      %c0_83 = arith.constant 0 : index
      %c0_84 = arith.constant 0 : index
      %182 = vector.load %arg19[%c0_83, %c0_84] : memref<16x16xf32, #tpu.memory_space<vmem>>, vector<16x16xf32>
      tpu.vector_store %arg19[%c0_83, %c0_84], %181 {strides = array<i32>} : memref<16x16xf32, #tpu.memory_space<vmem>>, vector<16x16xf32>,
    } else {
    }
    %c0 = arith.constant 0 : index
    %c0_1 = arith.constant 0 : index
    %3 = vector.load %arg18[%c0, %c0_1] : memref<16x128xf32, #tpu.memory_space<vmem>>, vector<16x128xf32>
    %4 = arith.truncf %3 : vector<16x128xf32> to vector<16x128xbf16>
    %c0_2 = arith.constant 0 : index
    %c0_3 = arith.constant 0 : index
    %5 = vector.load %arg19[%c0_2, %c0_3] : memref<16x16xf32, #tpu.memory_space<vmem>>, vector<16x16xf32>
    %6 = tpu.iota {dimensions = array<i32: 1>} : vector<1x128xi32>
    %c32_i32 = arith.constant 32 : i32
    %7 = vector.broadcast %c32_i32 : i32 to vector<1x128xi32>
    %8 = arith.cmpi slt, %6, %7 : vector<1x128xi32>
    %9 = arith.extui %8 : vector<1x128xi1> to vector<1x128xi32>
    %10 = arith.sitofp %9 : vector<1x128xi32> to vector<1x128xf32>
    %c0_4 = arith.constant 0 : index
    %c0_5 = arith.constant 0 : index
    %c0_6 = arith.constant 0 : index
    %11 = vector.load %arg4[%c0_4, %c0_5, %c0_6] : memref<1x128x128xbf16, #tpu.memory_space<vmem>>, vector<1x128x128xbf16>
    %12 = vector.shape_cast %11 : vector<1x128x128xbf16> to vector<128x128xbf16>
    %cst = arith.constant dense<0.000000e+00> : vector<16x128xf32>
    %13 = tpu.matmul %4, %12, %cst {dimension_numbers = #tpu.dot_dimension_numbers<[1], [0], [0], [1], [0, 0, 1, 1], [], []>} : vector<16x128xbf16>, vector<128x128xbf16>, vector<16x128xf32> -> vector<16x128xf32>
    %c0_7 = arith.constant 0 : index
    %c0_8 = arith.constant 0 : index
    %c0_9 = arith.constant 0 : index
    %14 = vector.load %arg5[%c0_7, %c0_8, %c0_9] : memref<1x1x128xf32, #tpu.memory_space<vmem>>, vector<1x1x128xf32>
    %15 = vector.shape_cast %14 : vector<1x1x128xf32> to vector<1x128xf32>
    %16 = vector.broadcast %15 : vector<1x128xf32> to vector<16x128xf32>
    %17 = arith.addf %13, %16 : vector<16x128xf32>
    %18 = arith.truncf %17 : vector<16x128xf32> to vector<16x128xbf16>
    %19 = vector.extract_strided_slice %18 {offsets = [0, 0], sizes = [16, 8], strides = [1, 1]} : vector<16x128xbf16> to vector<16x8xbf16>
    %20 = vector.extract_strided_slice %18 {offsets = [0, 32], sizes = [16, 8], strides = [1, 1]} : vector<16x128xbf16> to vector<16x8xbf16>
    %21 = vector.extract_strided_slice %18 {offsets = [0, 64], sizes = [16, 8], strides = [1, 1]} : vector<16x128xbf16> to vector<16x8xbf16>
    %cst_10 = arith.constant dense<0.000000e+00> : vector<16x16xf32>
    %22 = tpu.matmul %19, %20, %cst_10 {dimension_numbers = #tpu.dot_dimension_numbers<[1], [1], [0], [0], [0, 0, 1, 0], [], []>} : vector<16x8xbf16>, vector<16x8xbf16>, vector<16x16xf32> -> vector<16x16xf32>
    %23 = arith.addf %22, %5 : vector<16x16xf32>
    %cst_11 = arith.constant dense<0xFF800000> : vector<16xf32>
    %24 = vector.multi_reduction <maximumf>, %23, %cst_11 [1] : vector<16x16xf32> to vector<16xf32>
    %25 = vector.shape_cast %24 : vector<16xf32> to vector<16x1xf32>
    %26 = vector.broadcast %25 : vector<16x1xf32> to vector<16x16xf32>
    %27 = arith.subf %23, %26 : vector<16x16xf32>
    %28 = math.exp %27 : vector<16x16xf32>
    %cst_12 = arith.constant dense<0.000000e+00> : vector<16xf32>
    %29 = vector.multi_reduction <add>, %28, %cst_12 [1] : vector<16x16xf32> to vector<16xf32>
    %30 = vector.shape_cast %29 : vector<16xf32> to vector<16x1xf32>
    %31 = tpu.reciprocal %30 {approx = true} : vector<16x1xf32> -> vector<16x1xf32>
    %32 = vector.broadcast %31 : vector<16x1xf32> to vector<16x16xf32>
    %33 = arith.mulf %28, %32 : vector<16x16xf32>
    %34 = arith.truncf %33 : vector<16x16xf32> to vector<16x16xbf16>
    %cst_13 = arith.constant dense<0.000000e+00> : vector<16x8xf32>
    %35 = tpu.matmul %34, %21, %cst_13 {dimension_numbers = #tpu.dot_dimension_numbers<[1], [0], [0], [1], [0, 0, 1, 1], [], []>} : vector<16x16xbf16>, vector<16x8xbf16>, vector<16x8xf32> -> vector<16x8xf32>
    %36 = vector.extract_strided_slice %18 {offsets = [0, 8], sizes = [16, 8], strides = [1, 1]} : vector<16x128xbf16> to vector<16x8xbf16>
    %37 = vector.extract_strided_slice %18 {offsets = [0, 40], sizes = [16, 8], strides = [1, 1]} : vector<16x128xbf16> to vector<16x8xbf16>
    %38 = vector.extract_strided_slice %18 {offsets = [0, 72], sizes = [16, 8], strides = [1, 1]} : vector<16x128xbf16> to vector<16x8xbf16>
    %cst_14 = arith.constant dense<0.000000e+00> : vector<16x16xf32>
    %39 = tpu.matmul %36, %37, %cst_14 {dimension_numbers = #tpu.dot_dimension_numbers<[1], [1], [0], [0], [0, 0, 1, 0], [], []>} : vector<16x8xbf16>, vector<16x8xbf16>, vector<16x16xf32> -> vector<16x16xf32>
    %40 = arith.addf %39, %5 : vector<16x16xf32>
    %cst_15 = arith.constant dense<0xFF800000> : vector<16xf32>
    %41 = vector.multi_reduction <maximumf>, %40, %cst_15 [1] : vector<16x16xf32> to vector<16xf32>
    %42 = vector.shape_cast %41 : vector<16xf32> to vector<16x1xf32>
    %43 = vector.broadcast %42 : vector<16x1xf32> to vector<16x16xf32>
    %44 = arith.subf %40, %43 : vector<16x16xf32>
    %45 = math.exp %44 : vector<16x16xf32>
    %cst_16 = arith.constant dense<0.000000e+00> : vector<16xf32>
    %46 = vector.multi_reduction <add>, %45, %cst_16 [1] : vector<16x16xf32> to vector<16xf32>
    %47 = vector.shape_cast %46 : vector<16xf32> to vector<16x1xf32>
    %48 = tpu.reciprocal %47 {approx = true} : vector<16x1xf32> -> vector<16x1xf32>
    %49 = vector.broadcast %48 : vector<16x1xf32> to vector<16x16xf32>
    %50 = arith.mulf %45, %49 : vector<16x16xf32>
    %51 = arith.truncf %50 : vector<16x16xf32> to vector<16x16xbf16>
    %cst_17 = arith.constant dense<0.000000e+00> : vector<16x8xf32>
    %52 = tpu.matmul %51, %38, %cst_17 {dimension_numbers = #tpu.dot_dimension_numbers<[1], [0], [0], [1], [0, 0, 1, 1], [], []>} : vector<16x16xbf16>, vector<16x8xbf16>, vector<16x8xf32> -> vector<16x8xf32>
    %53 = vector.extract_strided_slice %18 {offsets = [0, 16], sizes = [16, 8], strides = [1, 1]} : vector<16x128xbf16> to vector<16x8xbf16>
    %54 = vector.extract_strided_slice %18 {offsets = [0, 48], sizes = [16, 8], strides = [1, 1]} : vector<16x128xbf16> to vector<16x8xbf16>
    %55 = vector.extract_strided_slice %18 {offsets = [0, 80], sizes = [16, 8], strides = [1, 1]} : vector<16x128xbf16> to vector<16x8xbf16>
    %cst_18 = arith.constant dense<0.000000e+00> : vector<16x16xf32>
    %56 = tpu.matmul %53, %54, %cst_18 {dimension_numbers = #tpu.dot_dimension_numbers<[1], [1], [0], [0], [0, 0, 1, 0], [], []>} : vector<16x8xbf16>, vector<16x8xbf16>, vector<16x16xf32> -> vector<16x16xf32>
    %57 = arith.addf %56, %5 : vector<16x16xf32>
    %cst_19 = arith.constant dense<0xFF800000> : vector<16xf32>
    %58 = vector.multi_reduction <maximumf>, %57, %cst_19 [1] : vector<16x16xf32> to vector<16xf32>
    %59 = vector.shape_cast %58 : vector<16xf32> to vector<16x1xf32>
    %60 = vector.broadcast %59 : vector<16x1xf32> to vector<16x16xf32>
    %61 = arith.subf %57, %60 : vector<16x16xf32>
    %62 = math.exp %61 : vector<16x16xf32>
    %cst_20 = arith.constant dense<0.000000e+00> : vector<16xf32>
    %63 = vector.multi_reduction <add>, %62, %cst_20 [1] : vector<16x16xf32> to vector<16xf32>
    %64 = vector.shape_cast %63 : vector<16xf32> to vector<16x1xf32>
    %65 = tpu.reciprocal %64 {approx = true} : vector<16x1xf32> -> vector<16x1xf32>
    %66 = vector.broadcast %65 : vector<16x1xf32> to vector<16x16xf32>
    %67 = arith.mulf %62, %66 : vector<16x16xf32>
    %68 = arith.truncf %67 : vector<16x16xf32> to vector<16x16xbf16>
    %cst_21 = arith.constant dense<0.000000e+00> : vector<16x8xf32>
    %69 = tpu.matmul %68, %55, %cst_21 {dimension_numbers = #tpu.dot_dimension_numbers<[1], [0], [0], [1], [0, 0, 1, 1], [], []>} : vector<16x16xbf16>, vector<16x8xbf16>, vector<16x8xf32> -> vector<16x8xf32>
    %70 = vector.extract_strided_slice %18 {offsets = [0, 24], sizes = [16, 8], strides = [1, 1]} : vector<16x128xbf16> to vector<16x8xbf16>
    %71 = vector.extract_strided_slice %18 {offsets = [0, 56], sizes = [16, 8], strides = [1, 1]} : vector<16x128xbf16> to vector<16x8xbf16>
    %72 = vector.extract_strided_slice %18 {offsets = [0, 88], sizes = [16, 8], strides = [1, 1]} : vector<16x128xbf16> to vector<16x8xbf16>
    %cst_22 = arith.constant dense<0.000000e+00> : vector<16x16xf32>
    %73 = tpu.matmul %70, %71, %cst_22 {dimension_numbers = #tpu.dot_dimension_numbers<[1], [1], [0], [0], [0, 0, 1, 0], [], []>} : vector<16x8xbf16>, vector<16x8xbf16>, vector<16x16xf32> -> vector<16x16xf32>
    %74 = arith.addf %73, %5 : vector<16x16xf32>
    %cst_23 = arith.constant dense<0xFF800000> : vector<16xf32>
    %75 = vector.multi_reduction <maximumf>, %74, %cst_23 [1] : vector<16x16xf32> to vector<16xf32>
    %76 = vector.shape_cast %75 : vector<16xf32> to vector<16x1xf32>
    %77 = vector.broadcast %76 : vector<16x1xf32> to vector<16x16xf32>
    %78 = arith.subf %74, %77 : vector<16x16xf32>
    %79 = math.exp %78 : vector<16x16xf32>
    %cst_24 = arith.constant dense<0.000000e+00> : vector<16xf32>
    %80 = vector.multi_reduction <add>, %79, %cst_24 [1] : vector<16x16xf32> to vector<16xf32>
    %81 = vector.shape_cast %80 : vector<16xf32> to vector<16x1xf32>
    %82 = tpu.reciprocal %81 {approx = true} : vector<16x1xf32> -> vector<16x1xf32>
    %83 = vector.broadcast %82 : vector<16x1xf32> to vector<16x16xf32>
    %84 = arith.mulf %79, %83 : vector<16x16xf32>
    %85 = arith.truncf %84 : vector<16x16xf32> to vector<16x16xbf16>
    %cst_25 = arith.constant dense<0.000000e+00> : vector<16x8xf32>
    %86 = tpu.matmul %85, %72, %cst_25 {dimension_numbers = #tpu.dot_dimension_numbers<[1], [0], [0], [1], [0, 0, 1, 1], [], []>} : vector<16x16xbf16>, vector<16x8xbf16>, vector<16x8xf32> -> vector<16x8xf32>
    %87 = tpu.concatenate %35, %52, %69, %86 in 1 : vector<16x8xf32>, vector<16x8xf32>, vector<16x8xf32>, vector<16x8xf32> -> vector<16x32xf32>
    %88 = arith.truncf %87 : vector<16x32xf32> to vector<16x32xbf16>
    %c0_26 = arith.constant 0 : index
    %c0_27 = arith.constant 0 : index
    %c0_28 = arith.constant 0 : index
    %89 = vector.load %arg6[%c0_26, %c0_27, %c0_28] : memref<1x32x128xbf16, #tpu.memory_space<vmem>>, vector<1x32x128xbf16>
    %90 = vector.shape_cast %89 : vector<1x32x128xbf16> to vector<32x128xbf16>
    %cst_29 = arith.constant dense<0.000000e+00> : vector<16x128xf32>
    %91 = tpu.matmul %88, %90, %cst_29 {dimension_numbers = #tpu.dot_dimension_numbers<[1], [0], [0], [1], [0, 0, 1, 1], [], []>} : vector<16x32xbf16>, vector<32x128xbf16>, vector<16x128xf32> -> vector<16x128xf32>
    %c0_30 = arith.constant 0 : index
    %c0_31 = arith.constant 0 : index
    %c0_32 = arith.constant 0 : index
    %92 = vector.load %arg7[%c0_30, %c0_31, %c0_32] : memref<1x1x128xf32, #tpu.memory_space<vmem>>, vector<1x1x128xf32>
    %93 = vector.shape_cast %92 : vector<1x1x128xf32> to vector<1x128xf32>
    %94 = vector.broadcast %93 : vector<1x128xf32> to vector<16x128xf32>
    %95 = arith.addf %91, %94 : vector<16x128xf32>
    %96 = arith.addf %3, %95 : vector<16x128xf32>
    %c0_33 = arith.constant 0 : index
    %c0_34 = arith.constant 0 : index
    %c0_35 = arith.constant 0 : index
    %97 = vector.load %arg12[%c0_33, %c0_34, %c0_35] : memref<1x1x128xf32, #tpu.memory_space<vmem>>, vector<1x1x128xf32>
    %98 = vector.shape_cast %97 : vector<1x1x128xf32> to vector<1x128xf32>
    %c0_36 = arith.constant 0 : index
    %c0_37 = arith.constant 0 : index
    %c0_38 = arith.constant 0 : index
    %99 = vector.load %arg13[%c0_36, %c0_37, %c0_38] : memref<1x1x128xf32, #tpu.memory_space<vmem>>, vector<1x1x128xf32>
    %100 = vector.shape_cast %99 : vector<1x1x128xf32> to vector<1x128xf32>
    %cst_39 = arith.constant dense<0.000000e+00> : vector<16xf32>
    %101 = vector.multi_reduction <add>, %96, %cst_39 [1] : vector<16x128xf32> to vector<16xf32>
    %102 = vector.shape_cast %101 : vector<16xf32> to vector<16x1xf32>
    %cst_40 = arith.constant 3.125000e-02 : f32
    %103 = vector.broadcast %cst_40 : f32 to vector<16x1xf32>
    %104 = arith.mulf %102, %103 : vector<16x1xf32>
    %105 = vector.broadcast %104 : vector<16x1xf32> to vector<16x128xf32>
    %106 = arith.subf %96, %105 : vector<16x128xf32>
    %107 = vector.broadcast %10 : vector<1x128xf32> to vector<16x128xf32>
    %108 = arith.mulf %106, %107 : vector<16x128xf32>
    %109 = arith.mulf %108, %108 : vector<16x128xf32>
    %cst_41 = arith.constant dense<0.000000e+00> : vector<16xf32>
    %110 = vector.multi_reduction <add>, %109, %cst_41 [1] : vector<16x128xf32> to vector<16xf32>
    %111 = vector.shape_cast %110 : vector<16xf32> to vector<16x1xf32>
    %cst_42 = arith.constant 3.125000e-02 : f32
    %112 = vector.broadcast %cst_42 : f32 to vector<16x1xf32>
    %113 = arith.mulf %111, %112 : vector<16x1xf32>
    %cst_43 = arith.constant 9.99999974E-6 : f32
    %114 = vector.broadcast %cst_43 : f32 to vector<16x1xf32>
    %115 = arith.addf %113, %114 : vector<16x1xf32>
    %116 = math.rsqrt %115 : vector<16x1xf32>
    %117 = vector.broadcast %116 : vector<16x1xf32> to vector<16x128xf32>
    %118 = arith.mulf %108, %117 : vector<16x128xf32>
    %119 = vector.broadcast %98 : vector<1x128xf32> to vector<16x128xf32>
    %120 = arith.mulf %118, %119 : vector<16x128xf32>
    %121 = vector.broadcast %100 : vector<1x128xf32> to vector<16x128xf32>
    %122 = arith.addf %120, %121 : vector<16x128xf32>
    %123 = arith.truncf %122 : vector<16x128xf32> to vector<16x128xbf16>
    %c0_44 = arith.constant 0 : index
    %c0_45 = arith.constant 0 : index
    %c0_46 = arith.constant 0 : index
    %124 = vector.load %arg8[%c0_44, %c0_45, %c0_46] : memref<1x128x128xbf16, #tpu.memory_space<vmem>>, vector<1x128x128xbf16>
    %125 = vector.shape_cast %124 : vector<1x128x128xbf16> to vector<128x128xbf16>
    %cst_47 = arith.constant dense<0.000000e+00> : vector<16x128xf32>
    %126 = tpu.matmul %123, %125, %cst_47 {dimension_numbers = #tpu.dot_dimension_numbers<[1], [0], [0], [1], [0, 0, 1, 1], [], []>} : vector<16x128xbf16>, vector<128x128xbf16>, vector<16x128xf32> -> vector<16x128xf32>
    %c0_48 = arith.constant 0 : index
    %c0_49 = arith.constant 0 : index
    %c0_50 = arith.constant 0 : index
    %127 = vector.load %arg9[%c0_48, %c0_49, %c0_50] : memref<1x1x128xf32, #tpu.memory_space<vmem>>, vector<1x1x128xf32>
    %128 = vector.shape_cast %127 : vector<1x1x128xf32> to vector<1x128xf32>
    %129 = vector.broadcast %128 : vector<1x128xf32> to vector<16x128xf32>
    %130 = arith.addf %126, %129 : vector<16x128xf32>
    %cst_51 = arith.constant 0.000000e+00 : f32
    %131 = vector.broadcast %cst_51 : f32 to vector<16x128xf32>
    %132 = arith.maximumf %130, %131 : vector<16x128xf32>
    %133 = arith.truncf %132 : vector<16x128xf32> to vector<16x128xbf16>
    %c0_52 = arith.constant 0 : index
    %c0_53 = arith.constant 0 : index
    %c0_54 = arith.constant 0 : index
    %134 = vector.load %arg10[%c0_52, %c0_53, %c0_54] : memref<1x128x128xbf16, #tpu.memory_space<vmem>>, vector<1x128x128xbf16>
    %135 = vector.shape_cast %134 : vector<1x128x128xbf16> to vector<128x128xbf16>
    %cst_55 = arith.constant dense<0.000000e+00> : vector<16x128xf32>
    %136 = tpu.matmul %133, %135, %cst_55 {dimension_numbers = #tpu.dot_dimension_numbers<[1], [0], [0], [1], [0, 0, 1, 1], [], []>} : vector<16x128xbf16>, vector<128x128xbf16>, vector<16x128xf32> -> vector<16x128xf32>
    %c0_56 = arith.constant 0 : index
    %c0_57 = arith.constant 0 : index
    %c0_58 = arith.constant 0 : index
    %137 = vector.load %arg11[%c0_56, %c0_57, %c0_58] : memref<1x1x128xf32, #tpu.memory_space<vmem>>, vector<1x1x128xf32>
    %138 = vector.shape_cast %137 : vector<1x1x128xf32> to vector<1x128xf32>
    %139 = vector.broadcast %138 : vector<1x128xf32> to vector<16x128xf32>
    %140 = arith.addf %136, %139 : vector<16x128xf32>
    %141 = arith.addf %122, %140 : vector<16x128xf32>
    %c0_59 = arith.constant 0 : index
    %c0_60 = arith.constant 0 : index
    %c0_61 = arith.constant 0 : index
    %142 = vector.load %arg14[%c0_59, %c0_60, %c0_61] : memref<1x1x128xf32, #tpu.memory_space<vmem>>, vector<1x1x128xf32>
    %143 = vector.shape_cast %142 : vector<1x1x128xf32> to vector<1x128xf32>
    %c0_62 = arith.constant 0 : index
    %c0_63 = arith.constant 0 : index
    %c0_64 = arith.constant 0 : index
    %144 = vector.load %arg15[%c0_62, %c0_63, %c0_64] : memref<1x1x128xf32, #tpu.memory_space<vmem>>, vector<1x1x128xf32>
    %145 = vector.shape_cast %144 : vector<1x1x128xf32> to vector<1x128xf32>
    %cst_65 = arith.constant dense<0.000000e+00> : vector<16xf32>
    %146 = vector.multi_reduction <add>, %141, %cst_65 [1] : vector<16x128xf32> to vector<16xf32>
    %147 = vector.shape_cast %146 : vector<16xf32> to vector<16x1xf32>
    %cst_66 = arith.constant 3.125000e-02 : f32
    %148 = vector.broadcast %cst_66 : f32 to vector<16x1xf32>
    %149 = arith.mulf %147, %148 : vector<16x1xf32>
    %150 = vector.broadcast %149 : vector<16x1xf32> to vector<16x128xf32>
    %151 = arith.subf %141, %150 : vector<16x128xf32>
    %152 = vector.broadcast %10 : vector<1x128xf32> to vector<16x128xf32>
    %153 = arith.mulf %151, %152 : vector<16x128xf32>
    %154 = arith.mulf %153, %153 : vector<16x128xf32>
    %cst_67 = arith.constant dense<0.000000e+00> : vector<16xf32>
    %155 = vector.multi_reduction <add>, %154, %cst_67 [1] : vector<16x128xf32> to vector<16xf32>
    %156 = vector.shape_cast %155 : vector<16xf32> to vector<16x1xf32>
    %cst_68 = arith.constant 3.125000e-02 : f32
    %157 = vector.broadcast %cst_68 : f32 to vector<16x1xf32>
    %158 = arith.mulf %156, %157 : vector<16x1xf32>
    %cst_69 = arith.constant 9.99999974E-6 : f32
    %159 = vector.broadcast %cst_69 : f32 to vector<16x1xf32>
    %160 = arith.addf %158, %159 : vector<16x1xf32>
    %161 = math.rsqrt %160 : vector<16x1xf32>
    %162 = vector.broadcast %161 : vector<16x1xf32> to vector<16x128xf32>
    %163 = arith.mulf %153, %162 : vector<16x128xf32>
    %164 = vector.broadcast %143 : vector<1x128xf32> to vector<16x128xf32>
    %165 = arith.mulf %163, %164 : vector<16x128xf32>
    %166 = vector.broadcast %145 : vector<1x128xf32> to vector<16x128xf32>
    %167 = arith.addf %165, %166 : vector<16x128xf32>
    %c0_70 = arith.constant 0 : index
    %c0_71 = arith.constant 0 : index
    %168 = vector.load %arg18[%c0_70, %c0_71] : memref<16x128xf32, #tpu.memory_space<vmem>>, vector<16x128xf32>
    tpu.vector_store %arg18[%c0_70, %c0_71], %167 {strides = array<i32>} : memref<16x128xf32, #tpu.memory_space<vmem>>, vector<16x128xf32>,
    %c1_i32 = arith.constant 1 : i32
    %169 = arith.cmpi eq, %arg0, %c1_i32 : i32
    %170 = arith.extui %169 : i1 to i32
    %c0_i32_72 = arith.constant 0 : i32
    %171 = arith.cmpi ne, %170, %c0_i32_72 : i32
    scf.if %171 {
      %c0_73 = arith.constant 0 : index
      %c0_74 = arith.constant 0 : index
      %172 = vector.load %arg18[%c0_73, %c0_74] : memref<16x128xf32, #tpu.memory_space<vmem>>, vector<16x128xf32>
      %c0_75 = arith.constant 0 : index
      %c0_76 = arith.constant 0 : index
      %173 = vector.load %arg16[%c0_75, %c0_76] : memref<1x128xf32, #tpu.memory_space<vmem>>, vector<1x128xf32>
      %c0_77 = arith.constant 0 : index
      %c0_78 = arith.constant 0 : index
      %174 = vector.load %arg17[%c0_77, %c0_78] : memref<1x128xf32, #tpu.memory_space<vmem>>, vector<1x128xf32>
      %cst_79 = arith.constant dense<0.000000e+00> : vector<16xf32>
      %175 = vector.multi_reduction <add>, %172, %cst_79 [1] : vector<16x128xf32> to vector<16xf32>
      %176 = vector.shape_cast %175 : vector<16xf32> to vector<16x1xf32>
      %cst_80 = arith.constant 3.125000e-02 : f32
      %177 = vector.broadcast %cst_80 : f32 to vector<16x1xf32>
      %178 = arith.mulf %176, %177 : vector<16x1xf32>
      %179 = vector.broadcast %178 : vector<16x1xf32> to vector<16x128xf32>
      %180 = arith.subf %172, %179 : vector<16x128xf32>
      %181 = vector.broadcast %10 : vector<1x128xf32> to vector<16x128xf32>
      %182 = arith.mulf %180, %181 : vector<16x128xf32>
      %183 = arith.mulf %182, %182 : vector<16x128xf32>
      %cst_81 = arith.constant dense<0.000000e+00> : vector<16xf32>
      %184 = vector.multi_reduction <add>, %183, %cst_81 [1] : vector<16x128xf32> to vector<16xf32>
      %185 = vector.shape_cast %184 : vector<16xf32> to vector<16x1xf32>
      %cst_82 = arith.constant 3.125000e-02 : f32
      %186 = vector.broadcast %cst_82 : f32 to vector<16x1xf32>
      %187 = arith.mulf %185, %186 : vector<16x1xf32>
      %cst_83 = arith.constant 9.99999974E-6 : f32
      %188 = vector.broadcast %cst_83 : f32 to vector<16x1xf32>
      %189 = arith.addf %187, %188 : vector<16x1xf32>
      %190 = math.rsqrt %189 : vector<16x1xf32>
      %191 = vector.broadcast %190 : vector<16x1xf32> to vector<16x128xf32>
      %192 = arith.mulf %182, %191 : vector<16x128xf32>
      %193 = vector.broadcast %173 : vector<1x128xf32> to vector<16x128xf32>
      %194 = arith.mulf %192, %193 : vector<16x128xf32>
      %195 = vector.broadcast %174 : vector<1x128xf32> to vector<16x128xf32>
      %196 = arith.addf %194, %195 : vector<16x128xf32>
      %c0_84 = arith.constant 0 : index
      %c0_85 = arith.constant 0 : index
      %197 = vector.load %arg18[%c0_84, %c0_85] : memref<16x128xf32, #tpu.memory_space<vmem>>, vector<16x128xf32>
      tpu.vector_store %arg18[%c0_84, %c0_85], %196 {strides = array<i32>} : memref<16x128xf32, #tpu.memory_space<vmem>>, vector<16x128xf32>,
    } else {
    }
    return
  }
  func.func @transform_0(%arg0: i32) -> (i32, i32) {
    %c0_i32 = arith.constant 0 : i32
    %c0_i32_0 = arith.constant 0 : i32
    %c0_i32_1 = arith.constant 0 : i32
    return %c0_i32, %c0_i32_0 : i32, i32
  }
  func.func @transform_1(%arg0: i32) -> (i32, i32) {
    %c0_i32 = arith.constant 0 : i32
    %c0_i32_0 = arith.constant 0 : i32
    %c0_i32_1 = arith.constant 0 : i32
    return %c0_i32, %c0_i32_0 : i32, i32
  }
  func.func @transform_2(%arg0: i32) -> (i32, i32) {
    %c0_i32 = arith.constant 0 : i32
    %c0_i32_0 = arith.constant 0 : i32
    %c0_i32_1 = arith.constant 0 : i32
    return %c0_i32, %c0_i32_0 : i32, i32
  }
  func.func @transform_3(%arg0: i32) -> (i32, i32, i32) {
    %c0_i32 = arith.constant 0 : i32
    %c0_i32_0 = arith.constant 0 : i32
    %c0_i32_1 = arith.constant 0 : i32
    return %arg0, %c0_i32, %c0_i32_0 : i32, i32, i32
  }
  func.func @transform_4(%arg0: i32) -> (i32, i32, i32) {
    %c0_i32 = arith.constant 0 : i32
    %c0_i32_0 = arith.constant 0 : i32
    %c0_i32_1 = arith.constant 0 : i32
    return %arg0, %c0_i32, %c0_i32_0 : i32, i32, i32
  }
  func.func @transform_5(%arg0: i32) -> (i32, i32, i32) {
    %c0_i32 = arith.constant 0 : i32
    %c0_i32_0 = arith.constant 0 : i32
    %c0_i32_1 = arith.constant 0 : i32
    return %arg0, %c0_i32, %c0_i32_0 : i32, i32, i32
  }
  func.func @transform_6(%arg0: i32) -> (i32, i32, i32) {
    %c0_i32 = arith.constant 0 : i32
    %c0_i32_0 = arith.constant 0 : i32
    %c0_i32_1 = arith.constant 0 : i32
    return %arg0, %c0_i32, %c0_i32_0 : i32, i32, i32
  }
  func.func @transform_7(%arg0: i32) -> (i32, i32, i32) {
    %c0_i32 = arith.constant 0 : i32
    %c0_i32_0 = arith.constant 0 : i32
    %c0_i32_1 = arith.constant 0 : i32
    return %arg0, %c0_i32, %c0_i32_0 : i32, i32, i32
  }
  func.func @transform_8(%arg0: i32) -> (i32, i32, i32) {
    %c0_i32 = arith.constant 0 : i32
    %c0_i32_0 = arith.constant 0 : i32
    %c0_i32_1 = arith.constant 0 : i32
    return %arg0, %c0_i32, %c0_i32_0 : i32, i32, i32
  }
  func.func @transform_9(%arg0: i32) -> (i32, i32, i32) {
    %c0_i32 = arith.constant 0 : i32
    %c0_i32_0 = arith.constant 0 : i32
    %c0_i32_1 = arith.constant 0 : i32
    return %arg0, %c0_i32, %c0_i32_0 : i32, i32, i32
  }
  func.func @transform_10(%arg0: i32) -> (i32, i32, i32) {
    %c0_i32 = arith.constant 0 : i32
    %c0_i32_0 = arith.constant 0 : i32
    %c0_i32_1 = arith.constant 0 : i32
    return %arg0, %c0_i32, %c0_i32_0 : i32, i32, i32
  }
  func.func @transform_11(%arg0: i32) -> (i32, i32, i32) {
    %c0_i32 = arith.constant 0 : i32
    %c0_i32_0 = arith.constant 0 : i32
    %c0_i32_1 = arith.constant 0 : i32
    return %arg0, %c0_i32, %c0_i32_0 : i32, i32, i32
  }
  func.func @transform_12(%arg0: i32) -> (i32, i32, i32) {
    %c0_i32 = arith.constant 0 : i32
    %c0_i32_0 = arith.constant 0 : i32
    %c0_i32_1 = arith.constant 0 : i32
    return %arg0, %c0_i32, %c0_i32_0 : i32, i32, i32
  }
  func.func @transform_13(%arg0: i32) -> (i32, i32, i32) {
    %c0_i32 = arith.constant 0 : i32
    %c0_i32_0 = arith.constant 0 : i32
    %c0_i32_1 = arith.constant 0 : i32
    return %arg0, %c0_i32, %c0_i32_0 : i32, i32, i32
  }
  func.func @transform_14(%arg0: i32) -> (i32, i32, i32) {
    %c0_i32 = arith.constant 0 : i32
    %c0_i32_0 = arith.constant 0 : i32
    %c0_i32_1 = arith.constant 0 : i32
    return %arg0, %c0_i32, %c0_i32_0 : i32, i32, i32
  }
  func.func @transform_15(%arg0: i32) -> (i32, i32) {
    %c0_i32 = arith.constant 0 : i32
    %c0_i32_0 = arith.constant 0 : i32
    %c0_i32_1 = arith.constant 0 : i32
    return %c0_i32, %c0_i32_0 : i32, i32
  }
  func.func @transform_16(%arg0: i32) -> (i32, i32) {
    %c0_i32 = arith.constant 0 : i32
    %c0_i32_0 = arith.constant 0 : i32
    %c0_i32_1 = arith.constant 0 : i32
    return %c0_i32, %c0_i32_0 : i32, i32
  }
  func.func @transform_17(%arg0: i32) -> (i32, i32) {
    %c0_i32 = arith.constant 0 : i32
    %c0_i32_0 = arith.constant 0 : i32
    %c0_i32_1 = arith.constant 0 : i32
    return %c0_i32, %c0_i32_0 : i32, i32
  }
}

</mosaic_0001>

<bundles_post_ra>
// kernel: tpu_custom_call.1
= control target key start
LH: loop header
LB: loop body
LE: loop exit
PB: predicated region body
PF: predicated region fallthrough
CT: control target
= control target key end

     0   :  { %s3342_s0 = inlined_call_operand.hbm [shape: f32[16,128], index: 0, kind: input, shape index: {}, may-alias: {0,17}]   ;;  %s3343_s1 = inlined_call_operand.vmem [shape: s32[16,1], index: 1, kind: input, shape index: {}]   ;;  %s3344_s2 = inlined_call_operand.vmem [shape: s32[1,16], index: 2, kind: input, shape index: {}]   ;;  %s3345_s3 = inlined_call_operand.hbm [shape: bf16[2,128,128], index: 3, kind: input, shape index: {}]   ;;  %s3346_s4 = inlined_call_operand.vmem [shape: f32[2,1,128], index: 4, kind: input, shape index: {}]   ;;  %s3347_s5 = inlined_call_operand.vmem [shape: bf16[2,32,128], index: 5, kind: input, shape index: {}]   ;;  %s3348_s6 = inlined_call_operand.vmem [shape: f32[2,1,128], index: 6, kind: input, shape index: {}]   ;;  %s3349_s7 = inlined_call_operand.hbm [shape: bf16[2,128,128], index: 7, kind: input, shape index: {}]   ;;  %s3350_s8 = inlined_call_operand.vmem [shape: f32[2,1,128], index: 8, kind: input, shape index: {}]   ;;  %s3351_s9 = inlined_call_operand.hbm [shape: bf16[2,128,128], index: 9, kind: input, shape index: {}]   ;;  %s3352_s10 = inlined_call_operand.vmem [shape: f32[2,1,128], index: 10, kind: input, shape index: {}]   ;;  %s3353_s11 = inlined_call_operand.vmem [shape: f32[2,1,128], index: 11, kind: input, shape index: {}]   ;;  %s3354_s12 = inlined_call_operand.vmem [shape: f32[2,1,128], index: 12, kind: input, shape index: {}]   ;;  %s3355_s13 = inlined_call_operand.vmem [shape: f32[2,1,128], index: 13, kind: input, shape index: {}]   ;;  %s3356_s14 = inlined_call_operand.vmem [shape: f32[2,1,128], index: 14, kind: input, shape index: {}]   ;;  %s3357_s15 = inlined_call_operand.vmem [shape: f32[1,128], index: 15, kind: input, shape index: {}]   ;;  %s3358_s16 = inlined_call_operand.vmem [shape: f32[1,128], index: 16, kind: input, shape index: {}]   ;;  %s3359_s17 = inlined_call_operand.hbm [shape: f32[16,128], index: 17, kind: output, shape index: {}, may-alias: {0,17}]  }
   0x1   :  { %3379 = sst [smem:[#allocation19_spill]] %s3342_s0 }
   0x2   :  { %3380 = sst [smem:[#allocation20_spill]] %s3343_s1 }
   0x3   :  { %3381 = sst [smem:[#allocation21_spill]] %s3344_s2 }
   0x4   :  { %3382 = sst [smem:[#allocation22_spill]] %s3345_s3 }
   0x5   :  { %3383 = sst [smem:[#allocation23_spill]] %s3347_s5 }
   0x6   :  { %3384 = sst [smem:[#allocation24_spill]] %s3349_s7 }
   0x7   :  { %3385 = sst [smem:[#allocation25_spill]] %s3351_s9 }
   0x8   :  { %3386 = sst [smem:[#allocation26_spill]] %s3352_s10 }
   0x9   :  { %3387 = sst [smem:[#allocation27_spill]] %s3353_s11 }
   0xa   :  { %3388 = sst [smem:[#allocation28_spill]] %s3354_s12 }
   0xb   :  { %3389 = sst [smem:[#allocation29_spill]] %s3355_s13 }
   0xc   :  { %3390 = sst [smem:[#allocation30_spill]] %s3356_s14 }
   0xd   :  { %3391 = sst [smem:[#allocation31_spill]] %s3357_s15 }
   0xe   :  { %3392 = sst [smem:[#allocation32_spill]] %s3358_s16 }
   0xf   :  { %3393 = sst [smem:[#allocation33_spill]] %s3359_s17 }
  0x10   :  { %22 = vsyncpa [#allocation4], 0 }
  0x11   :  { %23 = vsyncpa [#allocation7], 0 }
  0x12   :  { %25 = vsyncpa [#allocation7 + $0x1], 0 }
  0x13   :  { %26 = vsyncpa [#allocation10], 0 }
  0x14   :  { %28 = vsyncpa [#allocation10 + $0x1], 0 }
  0x15   :  { %29 = vsyncpa [#allocation5], 0  ;;  %s2807_s24 = smov 0   ;;  %s2809_s25 = smov 0  }
  0x16   :  { %s2811_s26 = smov 0   ;;  %s2813_s27 = smov 0  }
  0x17 LB: > { %3394 = sst [smem:[#allocation16_spill]] %s2683_s26  ;;  %s2828_s28 = sadd.s32 1, %s2687_s27   ;;  %s2687_s27 = sphi %s2813_s27, %s3434_s27   ;;  %s2683_s26 = sphi %s2811_s26, %s3436_s26   ;;  %s2679_s25 = sphi %s2809_s25, %s3438_s25   ;;  %s2675_s24 = sphi %s2807_s24, %s3437_s24  }
  0x18   : > { %3395 = sst [smem:[#allocation17_spill]] %s2828_s28  ;;  %s105_s29 = sadd.s32 1, %s2683_s26 }
  0x19   : > { %s102_s0 = ssub.s32 %s2687_s27, %s2828_s28  ;;  %p112_p0 = scmp.ne.s32.totalorder %s2683_s26, %s2679_s25 }
  0x1a   : > { %p103_p1 = scmp.eq.s32.totalorder %s102_s0, 0  ;;  %p113_p2 = scmp.eq.s32.totalorder %s2687_s27, 0 }
  0x1b   : > { %p2350_p3 = scmp.lt.s32.totalorder %s2687_s27, 2  ;;  %s516_s18 = sand.u32 1, %s2687_s27  }
  0x1c   : > { %s2838_s30 = scalar_select %p103_p1, %s2683_s26, %s105_s29  }
  0x1d   : > { %p114_p4 = por %p113_p2, %p112_p0  ;;  %s3362_s19 = sand.u32 1, %s2683_s26  }
  0x1e   : > { %3396 = sst [smem:[#allocation18_spill]] %s2838_s30  ;;  %s2844_s1 = sshll.u32 %s3362_s19, 6 }
  0x1f   : > { %s2847_s20 = sshll.u32 %s2687_s27, 10  ;;  %s3397_s3 = sld [smem:[#allocation22_spill]] }
  0x20   : > { %s520_s29 = scalar_lea.vmem [#allocation6], %s2844_s1  ;;  %p2856_p5 = pnand %p2350_p3, %p114_p4 }
  0x21   : > { %s527_s0 = sshll.u32 %s520_s29, 4  ;;  %s2862_s19 = scalar_lea.sflag [#allocation7], %s516_s18  ;;  %s2860_s0 = int_to_ptr.vmem [resolvable:$true] %s527_s0 }
  0x22   : > { %s3398_s30 = scalar_select %p2856_p5, 1, 0 }
  0x23   : > { %p2868_p7 = pneg %p2856_p5 }
  0x25   : > { %s2853_s23 = scalar_lea.hbm %s3397_s3, %s2847_s20  ;;  %s2502_s17 = scalar_lea.hbm %s3397_s3, 2048 }
  0x26   : > { %s2497_s28 = scalar_lea.hbm %s2853_s23, 1024  ;;  %p2503_p10 = scmp.lt.u32.totalorder %s2853_s23, %s3397_s3 }
  0x27   : > { %p2498_p6 = scmp.ne.s32.totalorder %s2853_s23, %s2497_s28  ;;  %p2504_p11 = scmp.lt.u32.totalorder %s2502_s17, %s2497_s28 }
  0x28   : > { %s3399_s21 = scalar_select %p2868_p7, 1, 0 }
  0x29   : > { %p2500_p8 = pnand %p2868_p7, %p2498_p6  ;;  %p2505_p12 = por %p2504_p11, %p2503_p10 }
  0x2a   : > { %p2506_p13 = scmp.lt.u32.totalorder %s2497_s28, %s2853_s23 }
  0x2b   : > { %p2501_p9 = pneg %p2500_p8 }
  0x2c   : > { %p2507_p0 = por %p2506_p13, %p2505_p12 }
  0x2e   : > { %p2508_p1 = pnand %p2507_p0, %p2501_p9 }
  0x30   : > { %2511 = shalt.err (!%p2508_p1)
}
  0x31   : > { %s2512_s18 = scalar_lea.vmem %s2860_s0, 1024  ;;  %s2689_s22 = smov [#allocation6]  }
  0x32   : > { %p2513_p2 = scmp.ne.s32.totalorder %s2860_s0, %s2512_s18  ;;  %s2517_s29 = sshll.u32 %s2689_s22, 4  ;;  %s2518_s29 = int_to_ptr.vmem [resolvable:$false] %s2517_s29 }
  0x33   : > { %s2519_s15 = scalar_lea.vmem %s2518_s29, 2048  ;;  %p2520_p6 = scmp.lt.s32.totalorder %s2860_s0, %s2518_s29 }
  0x34   : > { %p2515_p3 = pnand %p2513_p2, %p2868_p7  ;;  %p2521_p8 = scmp.lt.s32.totalorder %s2519_s15, %s2512_s18 }
  0x36   : > { %p2516_p4 = pneg %p2515_p3  ;;  %p2522_p10 = por %p2521_p8, %p2520_p6 }
  0x38   : > { %p2523_p11 = pnand %p2522_p10, %p2516_p4 }
  0x3a   : > { %2526 = shalt.err (!%p2523_p11)
}
  0x3b   : > { %s3366_s16 = smov 64   ;;  %s3368_s17 = smov 4  }
  0x3c   : > { %2342 = dma.hbm_to_vmem [thread:$0]  (!%p2856_p5), %s2853_s23, 1024, %s2860_s0, %s2862_s19, %s3366_s16, %s3366_s16, %s3368_s17  }
  0x3d   : > { %s2896_s28 = sadd.s32 4294967295, %s2687_s27   ;;  %p118_p12 = scmp.ne.s32.totalorder %s2679_s25, %s2675_s24 }
  0x3e   : > { %p3370_p9 = scmp.eq.s32.totalorder %s2896_s28, 0  ;;  %p2083_p13 = scmp.ge.s32.totalorder %s2687_s27, 1 }
  0x3f   : > { %p478_p0 = scmp.lt.s32.totalorder %s2687_s27, 3  ;;  %s2692_s23 = smov [#allocation3]  }
  0x40   : > { %p2906_p2 = por %p3370_p9, %p118_p12  ;;  %s490_s0 = sshll.u32 %s2692_s23, 4  ;;  %s2914_s0 = int_to_ptr.vmem [resolvable:$true] %s490_s0 }
  0x41   : > { %p2910_p3 = pnand %p2083_p13, %p478_p0  ;;  %s3402_s7 = sld [smem:[#allocation24_spill]] }
  0x42   : > { %s3400_s18 = scalar_select %p2906_p2, 1, 0 }
  0x43   : > { %s3401_s22 = scalar_select %p2910_p3, 1, 0 }
  0x44   : > { %p2335_p4 = pneg %p2910_p3  ;;  %s561_s16 = scalar_lea.vmem [#allocation8], %s2844_s1 }
  0x45   : > { %s568_s17 = sshll.u32 %s561_s16, 4  ;;  %s3404_s2 = sld [smem:[#allocation19_spill]]  ;;  %s2931_s17 = int_to_ptr.vmem [resolvable:$true] %s568_s17 }
  0x46   : > { %p2926_p6 = pnand %p2335_p4, %p3370_p9 }
  0x47   : > { %s2922_s27 = scalar_lea.hbm %s3402_s7, %s2847_s20 }
  0x48   : > { %p2529_p10 = pneg %p2926_p6 }
  0x4b   : > { %s2527_s14 = scalar_lea.hbm %s3404_s2, 256 }
  0x4c   : > { %p2528_p8 = scmp.ne.s32.totalorder %s3404_s2, %s2527_s14  ;;  %p2534_p13 = scmp.lt.u32.totalorder %s2527_s14, %s3404_s2 }
  0x4e   : > { %p2530_p11 = pnand %p2529_p10, %p2528_p8 }
  0x50   : > { %p2531_p12 = pneg %p2530_p11 }
  0x52   : > { %p2536_p0 = pnand %p2534_p13, %p2531_p12 }
  0x54   : > { %2539 = shalt.err (!%p2536_p0)
}
  0x55   : > { %s2540_s16 = scalar_lea.vmem %s2914_s0, 256  ;;  %p2548_p2 = scmp.lt.s32.totalorder %s2914_s0, %s2914_s0 }
  0x56   : > { %p2541_p4 = scmp.ne.s32.totalorder %s2914_s0, %s2540_s16  ;;  %p2549_p3 = scmp.lt.s32.totalorder %s2540_s16, %s2540_s16 }
  0x58   : > { %p2543_p1 = pnand %p2541_p4, %p2529_p10  ;;  %p2550_p5 = por %p2549_p3, %p2548_p2 }
  0x5a   : > { %p2544_p9 = pneg %p2543_p1 }
  0x5c   : > { %p2551_p7 = pnand %p2550_p5, %p2544_p9 }
  0x5e   : > { %2554 = shalt.err (!%p2551_p7)
}
  0x5f   : > { %s2693_s3 = smov 128   ;;  %s2694_s12 = smov 8  }
  0x60   : > { %2338 = dma.hbm_to_vmem [thread:$0]  (!%p2926_p6), %s3404_s2, 256, %s2914_s0, [#allocation4], %s2693_s3, %s2693_s3, %s2694_s12  }
  0x61   : > { %s2555_s23 = scalar_lea.hbm %s2922_s27, 1024  ;;  %p3405_p8 = scmp.ne.s32.totalorder %s3399_s21, 0 }
  0x62   : > { %p2556_p1 = scmp.ne.s32.totalorder %s2922_s27, %s2555_s23  ;;  %s2560_s16 = scalar_lea.hbm %s3402_s7, 2048 }
  0x63   : > { %p2561_p7 = scmp.lt.u32.totalorder %s2922_s27, %s3402_s7  ;;  %p2562_p9 = scmp.lt.u32.totalorder %s2560_s16, %s2555_s23 }
  0x64   : > { %p2558_p2 = pnand %p2556_p1, %p3405_p8  ;;  %p2564_p10 = scmp.lt.u32.totalorder %s2555_s23, %s2922_s27 }
  0x65   : > { %p2563_p3 = por %p2562_p9, %p2561_p7 }
  0x66   : > { %p2559_p5 = pneg %p2558_p2 }
  0x67   : > { %p2565_p11 = por %p2564_p10, %p2563_p3 }
  0x69   : > { %p2566_p12 = pnand %p2565_p11, %p2559_p5 }
  0x6b   : > { %2569 = shalt.err (!%p2566_p12)
}
  0x6c   : > { %s2570_s0 = scalar_lea.vmem %s2931_s17, 1024  ;;  %s2695_s15 = smov [#allocation8]  }
  0x6d   : > { %p2571_p6 = scmp.ne.s32.totalorder %s2931_s17, %s2570_s0  ;;  %s2575_s3 = sshll.u32 %s2695_s15, 4  ;;  %s2576_s3 = int_to_ptr.vmem [resolvable:$false] %s2575_s3 }
  0x6e   : > { %s2577_s10 = scalar_lea.vmem %s2576_s3, 2048  ;;  %p2578_p4 = scmp.lt.s32.totalorder %s2931_s17, %s2576_s3 }
  0x6f   : > { %p2573_p13 = pnand %p2571_p6, %p3405_p8  ;;  %p2579_p1 = scmp.lt.s32.totalorder %s2577_s10, %s2570_s0 }
  0x71   : > { %p2574_p0 = pneg %p2573_p13  ;;  %p2580_p2 = por %p2579_p1, %p2578_p4 }
  0x73   : > { %p2581_p7 = pnand %p2580_p2, %p2574_p0 }
  0x75   : > { %2584 = shalt.err (!%p2581_p7)
}
  0x76   : > { %p3406_p5 = scmp.ne.s32.totalorder %s3398_s30, 0  ;;  %s3407_s11 = smov 4  }
  0x77   : > { %s3408_s12 = smov 64   ;;  %s3409_s9 = sld [smem:[#allocation25_spill]] }
  0x78   : > { %2345 = dma.hbm_to_vmem [thread:$0]  (!%p3406_p5), %s2922_s27, 1024, %s2931_s17, %s2862_s19, %s3408_s12, %s3408_s12, %s3407_s11  }
  0x79   : > { %s588_s24 = scalar_lea.vmem [#allocation9], %s2844_s1  ;;  %s3410_s16 = sand.u32 1, %s2683_s26  }
  0x7a   : > { %s595_s29 = sshll.u32 %s588_s24, 4  ;;  %s2990_s0 = scalar_lea.sflag [#allocation10], %s3410_s16  ;;  %s2986_s29 = int_to_ptr.vmem [resolvable:$true] %s595_s29 }
  0x7d   : > { %s2983_s23 = scalar_lea.hbm %s3409_s9, %s2847_s20  ;;  %s2590_s20 = scalar_lea.hbm %s3409_s9, 2048 }
  0x7e   : > { %s2585_s15 = scalar_lea.hbm %s2983_s23, 1024  ;;  %p2591_p11 = scmp.lt.u32.totalorder %s2983_s23, %s3409_s9 }
  0x7f   : > { %p2586_p9 = scmp.ne.s32.totalorder %s2983_s23, %s2585_s15  ;;  %p2592_p12 = scmp.lt.u32.totalorder %s2590_s20, %s2585_s15 }
  0x80   : > { %p2594_p13 = scmp.lt.u32.totalorder %s2585_s15, %s2983_s23 }
  0x81   : > { %p2588_p3 = pnand %p2586_p9, %p3405_p8  ;;  %p2593_p6 = por %p2592_p12, %p2591_p11 }
  0x83   : > { %p2589_p10 = pneg %p2588_p3  ;;  %p2595_p0 = por %p2594_p13, %p2593_p6 }
  0x85   : > { %p2596_p4 = pnand %p2595_p0, %p2589_p10 }
  0x87   : > { %2599 = shalt.err (!%p2596_p4)
}
  0x88   : > { %s2600_s1 = scalar_lea.vmem %s2986_s29, 1024  ;;  %s2696_s10 = smov [#allocation9]  }
  0x89   : > { %p2601_p1 = scmp.ne.s32.totalorder %s2986_s29, %s2600_s1  ;;  %s2605_s13 = sshll.u32 %s2696_s10, 4  ;;  %s2606_s13 = int_to_ptr.vmem [resolvable:$false] %s2605_s13 }
  0x8a   : > { %s2607_s14 = scalar_lea.vmem %s2606_s13, 2048  ;;  %p2608_p9 = scmp.lt.s32.totalorder %s2986_s29, %s2606_s13 }
  0x8b   : > { %p2603_p2 = pnand %p2601_p1, %p3405_p8  ;;  %p2609_p3 = scmp.lt.s32.totalorder %s2607_s14, %s2600_s1 }
  0x8d   : > { %p2604_p7 = pneg %p2603_p2  ;;  %p2610_p11 = por %p2609_p3, %p2608_p9 }
  0x8f   : > { %p2611_p12 = pnand %p2610_p11, %p2604_p7 }
  0x91   : > { %2614 = shalt.err (!%p2611_p12)
}
  0x92   : > { %2348 = dma.hbm_to_vmem [thread:$0]  (!%p3406_p5), %s2983_s23, 1024, %s2986_s29, %s2990_s0, %s3408_s12, %s3408_s12, %s3407_s11  }
  0x93   : > { %p3411_p8 = scmp.ne.s32.totalorder %s3401_s22, 0 }
  0x94   : > { %p3412_p10 = scmp.eq.s32.totalorder (!%p3411_p8), %s2896_s28, 0 }
  0x95   : > { %637 = sbr.rel (%p3411_p8) target bundleno = 3767 (0xeb7), region = 88 }
  0x9c   : > { %2658 = dma.done.wait (%p3412_p10), [#allocation4], 256   ;;  %p3413_p6 = pmov %p3412_p10 }
  0x9d   : > { %s643_s30 = sand.u32 1, %s2896_s28   ;;  %s645_s21 = sand.u32 1, %s2679_s25  }
  0x9e   : > { %2660 = vsyncadd (%p3413_p6), [#allocation4], 4294967040  ;;  %s2097_s24 = sshll.u32 %s645_s21, 6  ;;  %s644_s16 = scalar_lea.sflag [#allocation7], %s643_s30 }
  0x9f   : > { %s3025_s15 = scalar_lea.vmem [#allocation6], %s2097_s24  ;;  %p3414_p13 = scmp.ne.s32.totalorder %s3400_s18, 0 }
  0xa1   : > { %2662 = dma.done.wait (%p3414_p13), %s644_s16, 2048  }
  0xa2   : > { %2664 = vsyncadd (%p3414_p13), %s644_s16, 4294965248  ;;  %s3031_s22 = scalar_lea.vmem [#allocation8], %s2097_s24  ;;  %s662_s11 = scalar_lea.sflag [#allocation10], %s645_s21 }
  0xa3   : > { %s3033_s12 = scalar_lea.vmem [#allocation9], %s2097_s24 }
  0xa4   : > { %2666 = dma.done.wait (%p3414_p13), %s662_s11, 1024  }
  0xa5   : > { %2668 = vsyncadd (%p3414_p13), %s662_s11, 4294966272  ;;  %p750_p5 = scmp.lt.s32.totalorder %s2896_s28, 1  ;;  %s3415_s5 = sld [smem:[#allocation23_spill]] }
  0xa6   : > { %s3416_s16 = sld [smem:[#allocation26_spill]]  ;;  %s3417_s19 = sld [smem:[#allocation27_spill]] }
  0xa7   : > { %s3041_s23 = scalar_select %p750_p5, %s2896_s28, 1 }
  0xa8   : > { %s3419_s3 = sld [smem:[#allocation29_spill]]  ;;  %s3420_s13 = sld [smem:[#allocation30_spill]] }
  0xa9   : > { %s2158_s18 = sshll.u32 %s3041_s23, 4  ;;  %s763_s30 = scalar_lea.vmem %s3350_s8, %s3041_s23 }
  0xaa   : > { %p3421_p0 = scmp.ne.s32.totalorder %s2896_s28, 0 }
  0xab   : > { %s3051_s27 = scalar_lea.vmem %s3415_s5, %s2158_s18  ;;  %s3418_s18 = sld [smem:[#allocation28_spill]]  ;;  %v2697_v1 = vmov (!%p3421_p0), 0   ;;  %v784_v3 = vld [vmem:[#allocation3] sm:$0xff] (!%p3421_p0)  ;;  %v785_v4 = vld [vmem:[#allocation3 + $0x8] sm:$0xff] (!%p3421_p0)  ;;  %vm805_vm0 = vcmask (!%p3421_p0), 130048  }
  0xac   : > { %s766_s11 = scalar_lea.vmem %s3416_s16, %s3041_s23  ;;  %s769_s2 = scalar_lea.vmem %s3417_s19, %s3041_s23  ;;  %2411 = vset.pattern.permute.xlu0 (!%p3421_p0), %v2697_v1  ;;  %786 = vst [vmem:[#allocation11] sm:$0xff] (!%p3421_p0), %v784_v3  ;;  %787 = vst [vmem:[#allocation11 + $0x8] sm:$0xff] (!%p3421_p0), %v785_v4  ;;  %v2698_v7 = vmov (!%p3421_p0), -1e+09  }
  0xad   : > { %783 = sbr.rel (%p3421_p0) target bundleno = 315 (0x13b), region = 108  ;;  %s3422_s16 = sld [smem:[#allocation20_spill]] (!%p3421_p0) }
  0xae   : > { %s775_s1 = scalar_lea.vmem %s3419_s3, %s3041_s23  ;;  %s778_s14 = scalar_lea.vmem %s3420_s13, %s3041_s23 }
  0xaf   : > { %s3423_s26 = sld [smem:[#allocation21_spill]] (!%p3421_p0) }
  0xb1   : > { %s772_s20 = scalar_lea.vmem %s3418_s18, %s3041_s23 }
  0xb3   : > { %v788_v0 = vld [vmem:[%s3422_s16] sm:$0xff] (!%p3421_p0)  ;;  %v789_v2 = vld [vmem:[%s3422_s16 + $0x8] sm:$0xff] (!%p3421_p0) }
  0xb4   : > { %792 = vperm.xlu0 %2411, %v788_v0  }
  0xb5   : > { %v2103_v5 = vld [vmem:[%s3423_s26] ss:$0 sm:$0xff] }
  0xb8   : > { %795 = vperm.xlu0 %2411, %v789_v2  }
 0x133   : > { %v793_v6 = vpop.permute.xlu0 %792 }
 0x134   : > { %vm801_vm1 = vcmp.eq.s32.totalorder %v793_v6, %v2103_v5 }
 0x135   : > { %v803_v8 = vsel %vm801_vm1, 0.0, %v2698_v7 }
 0x136   : > { %806 = vst.msk [vmem:[#allocation2] sm:$0xff] %vm805_vm0, %v803_v8 }
 0x137   : > { %v796_v9 = vpop.permute.xlu0 %795 }
 0x138   : > { %vm802_vm2 = vcmp.eq.s32.totalorder %v796_v9, %v2103_v5 }
 0x139   : > { %v804_v10 = vsel %vm802_vm2, 0.0, %v2698_v7 }
 0x13a   : > { %807 = vst.msk [vmem:[#allocation2 + $0x8] sm:$0xff] %vm805_vm0, %v804_v10 }
 0x13b PF: > { %v2427_v11 = vld [vmem:[%s3025_s15] sm:$0xff]   ;;  %v2699_v12 = vmov 0.0   ;;  %v2428_v13 = vld [vmem:[%s3025_s15 + $0x8] sm:$0xff]   ;;  %vm2700_vm3 = vmmov 0   ;;  %v2429_v14 = vld [vmem:[%s3025_s15 + $0x10] sm:$0xff]   ;;  %s2701_s0 = smov 96  }
 0x13c   : > { %2205 = vmatprep.subr.bf16.mxu0 %v2699_v12  ;;  %2225 = vmatprep.subr.bf16.mxu1 %v2699_v12  ;;  %v2430_v15 = vld [vmem:[%s3025_s15 + $0x18] sm:$0xff]   ;;  %v2431_v16 = vld [vmem:[%s3025_s15 + $0x20] sm:$0xff]   ;;  %v2432_v17 = vld [vmem:[%s3025_s15 + $0x28] sm:$0xff]   ;;  %vm934_vm4 = vcmask 64512   ;;  %vm982_vm5 = vcmask 130048   ;;  %s2702_s17 = smov 64  }
 0x13d   : > { %2206 = vmatpush3.bf16.msra.mxu0 %v2427_v11  ;;  %2221 = vmatprep.mubr.msk.bf16.mxu0 %vm2700_vm3, %v2699_v12  ;;  %v2433_v18 = vld [vmem:[%s3025_s15 + $0x30] sm:$0xff]   ;;  %v2434_v19 = vld [vmem:[%s3025_s15 + $0x38] sm:$0xff]   ;;  %v3112_v20 = vld [vmem:[#allocation11] sm:$0xff]  ;;  %s3424_s15 = scalar_lea.vmem %s3346_s4, %s3041_s23  ;;  %s2703_s18 = smov 80   ;;  %vm1444_vm6 = vcmask 195584   ;;  %vm1471_vm7 = vcmask 261120  }
 0x13e   : > { %2207 = vmatprep.subr.bf16.mxu0 %v2699_v12  ;;  %2227 = vmatprep.mubr.msk.bf16.mxu1 %vm2700_vm3, %v2699_v12  ;;  %v3114_v21 = vld [vmem:[#allocation11 + $0x8] sm:$0xff]  ;;  %v2105_v23 = vld [vmem:[%s3424_s15] ss:$0 sm:$0xff]  ;;  %s2704_s3 = smov 88   ;;  %s2705_s13 = smov 120  }
 0x13f   : > { %v810_v22 = vpack.c.bf16 %v3114_v21, %v3112_v20  ;;  %v3136_v33 = vld [vmem:[#allocation2] sm:$0xff]  ;;  %s2706_s21 = smov 112   ;;  %s2707_s24 = smov 72  }
 0x140   : > { %s2708_s7 = smov 104   ;;  %s2709_s19 = smov 56  }
 0x141   : > { %2208 = vmatpush3.bf16.msra.mxu0 %v2428_v13  ;;  %v3138_v35 = vld [vmem:[#allocation2 + $0x8] sm:$0xff]  ;;  %s2710_s5 = smov 40   ;;  %s2711_s9 = smov 48  }
 0x142   : > { %2209 = vmatprep.subr.bf16.mxu0 %v2699_v12  ;;  %s2712_s26 = smov 8   ;;  %s2713_s10 = smov 16  }
 0x143   : > { %s2714_s29 = smov 24   ;;  %p2148_p4 = scmp.ne.s32.totalorder %s2896_s28, 1 }
 0x144   : > { %s3432_s15 = sld [smem:[#allocation32_spill]] (!%p2148_p4) }
 0x145   : > { %2210 = vmatpush3.bf16.msra.mxu0 %v2429_v14 }
 0x146   : > { %2211 = vmatprep.subr.bf16.mxu0 %v2699_v12 }
 0x149   : > { %2212 = vmatpush3.bf16.msra.mxu0 %v2430_v15 }
 0x14a   : > { %2213 = vmatprep.subr.bf16.mxu0 %v2699_v12 }
 0x14d   : > { %2214 = vmatpush3.bf16.msra.mxu0 %v2431_v16 }
 0x14e   : > { %2215 = vmatprep.subr.bf16.mxu0 %v2699_v12 }
 0x151   : > { %2216 = vmatpush3.bf16.msra.mxu0 %v2432_v17 }
 0x152   : > { %2217 = vmatprep.subr.bf16.mxu0 %v2699_v12 }
 0x155   : > { %2218 = vmatpush3.bf16.msra.mxu0 %v2433_v18 }
 0x156   : > { %2219 = vmatprep.subr.bf16.mxu0 %v2699_v12 }
 0x159   : > { %2220 = vmatpush3.bf16.msra.mxu0 %v2434_v19 }
 0x15a   : > { %2249 = vmatprep.subr.bf16.mxu0 %v2699_v12 }
 0x15c   : > { %2222 = vmatmul.mubr.bf16.vlgmr.msra.gmra.mrb[0].mxu0 %v810_v22 }
 0x15d   : > { %2251 = vmatprep.mubr.msk.bf16.mxu0 %vm2700_vm3, %v2699_v12 }
 0x22f   : > { %v923_v24 = vpop.f32.mrb[0].mxu0 }
 0x230   : > { %v2223_v25 = vpop.f32.mrb[1].mxu0  ;;  %v924_v27 = vadd.f32 %v2105_v23, %v923_v24 }
 0x231   : > { %v926_v26 = vpop.f32.mrb[2].mxu0 }
 0x232   : > { %v927_v28 = vadd.f32 %v2105_v23, %v926_v26  ;;  %v2224_v29 = vpop.f32.mrb[3].mxu0 }
 0x234   : > { %v3127_v30 = vpack.c.bf16 %v927_v28, %v924_v27 }
 0x236   : > { %932 = vrot.lane.b32.xlu0 %v3127_v30, %s2701_s0  ;;  %s3425_s0 = scalar_lea.vmem %s3348_s6, %s3041_s23 }
 0x2a8   : > { %v933_v31 = vpop.permute.xlu0 %932 }
 0x2a9   : > { %v939_v32 = vsel %vm934_vm4, %v933_v31, 0 }
 0x2aa   : > { %2226 = vmatpush3.bf16.xpose.msra.mxu1 %v939_v32 }
 0x2ab   : > { %2231 = vmatprep.subr.bf16.mxu1 %v2699_v12 }
 0x2b1   : > { %2228 = vmatmul.mubr.msk.bf16.vlgmr.msra.gmra.mrb[0].mxu1 %vm934_vm4, %v3127_v30 }
 0x2b2   : > { %2233 = vmatprep.mubr.msk.bf16.mxu1 %vm2700_vm3, %v2699_v12 }
 0x384   : > { %v975_v34 = vpop.f32.mrb[0].mxu1 }
 0x385   : > { %v976_v36 = vadd.f32 %v975_v34, %v3136_v33  ;;  %v2229_v37 = vpop.f32.mrb[1].mxu1 }
 0x386   : > { %v978_v38 = vpop.f32.mrb[2].mxu1 }
 0x387   : > { %v979_v39 = vadd.f32 %v978_v38, %v3138_v35  ;;  %v2230_v40 = vpop.f32.mrb[3].mxu1  ;;  %v983_v41 = vsel %vm982_vm5, %v976_v36, -inf }
 0x388   : > { %984 = vmax.xlane.f32.xlu0 %v983_v41 }
 0x389   : > { %v986_v42 = vsel %vm982_vm5, %v979_v39, -inf }
 0x38a   : > { %987 = vmax.xlane.f32.xlu1 %v986_v42 }
 0x39b   : > { %1006 = vrot.lane.b32.xlu1 %v3127_v30, %s2702_s17 }
 0x39e   : > { %1176 = vrot.lane.b32.xlu0 %v3127_v30, %s2703_s18 }
 0x415   : > { %v985_v43 = vpop.xlane.xlu0 %984 }
 0x416   : > { %v989_v44 = vsub.f32 %v976_v36, %v985_v43 }
 0x417   : > { %v988_v45 = vpop.xlane.xlu1 %987 }
 0x418   : > { %v991_v46 = vmul.f32 1.442695, %v989_v44  ;;  %v990_v47 = vsub.f32 %v979_v39, %v988_v45 }
 0x419   : > { %v1177_v48 = vpop.permute.xlu0 %1176 }
 0x41a   : > { %2453 = vpow2.f32 %v991_v46  ;;  %v993_v49 = vmul.f32 1.442695, %v990_v47  ;;  %v1182_v50 = vsel %vm934_vm4, %v1177_v48, 0 }
 0x41b   : > { %2250 = vmatpush3.bf16.xpose.msra.mxu0 %v1182_v50  ;;  %v1007_v51 = vpop.permute.xlu1 %1006 }
 0x41c   : > { %2455 = vpow2.f32 %v993_v49  ;;  %2232 = vmatpush3.bf16.msra.mxu1 %v1007_v51  ;;  %2261 = vmatprep.subr.bf16.mxu0 %v2699_v12 }
 0x41d   : > { %2237 = vmatprep.subr.bf16.mxu1 %v2699_v12 }
 0x424   : > { %v2454_v52 = vpop.eup %2453 }
 0x425   : > { %v995_v53 = vsel %vm982_vm5, %v2454_v52, 0.0 }
 0x426   : > { %v2456_v54 = vpop.eup %2455  ;;  %996 = vadd.xlane.f32.xlu1 %v995_v53 }
 0x427   : > { %v998_v55 = vsel %vm982_vm5, %v2456_v54, 0.0 }
 0x42a   : > { %999 = vadd.xlane.f32.xlu1 %v998_v55 }
 0x43b   : > { %1055 = vrot.lane.b32.xlu1 %v3127_v30, %s2704_s3 }
 0x43f   : > { %1053 = vrot.lane.b32.xlu1 %v3127_v30, %s2705_s13 }
 0x443   : > { %1174 = vrot.lane.b32.xlu1 %v3127_v30, %s2706_s21 }
 0x447   : > { %1297 = vrot.lane.b32.xlu1 %v3127_v30, %s2707_s24 }
 0x44b   : > { %1295 = vrot.lane.b32.xlu1 %v3127_v30, %s2708_s7 }
 0x4b3   : > { %v997_v56 = vpop.xlane.xlu1 %996 }
 0x4b4   : > { %2457 = vrcp.f32 %v997_v56 }
 0x4b7   : > { %v1000_v57 = vpop.xlane.xlu1 %999 }
 0x4b8   : > { %2459 = vrcp.f32 %v1000_v57 }
 0x4bb   : > { %v1056_v58 = vpop.permute.xlu1 %1055 }
 0x4bc   : > { %v1061_v2 = vsel %vm934_vm4, %v1056_v58, 0 }
 0x4be   : > { %v2458_v60 = vpop.eup %2457 }
 0x4bf   : > { %v1054_v59 = vpop.permute.xlu1 %1053  ;;  %v1003_v62 = vmul.f32 %v2458_v60, %v2454_v52 }
 0x4c2   : > { %v2460_v61 = vpop.eup %2459 }
 0x4c3   : > { %v1004_v63 = vmul.f32 %v2460_v61, %v2456_v54  ;;  %v1175_v0 = vpop.permute.xlu1 %1174 }
 0x4c4   : > { %2252 = vmatmul.mubr.msk.bf16.vlgmr.msra.gmra.mrb[4].mxu0 %vm934_vm4, %v1175_v0 }
 0x4c5   : > { %v1005_v1 = vpack.c.bf16 %v1004_v63, %v1003_v62  ;;  %2263 = vmatprep.mubr.msk.bf16.mxu0 %vm2700_vm3, %v2699_v12 }
 0x4c7   : > { %2234 = vmatmul.mubr.msk.bf16.vlgmr.msra.gmra.mrb[4].mxu1 %vm982_vm5, %v1005_v1  ;;  %v1298_v3 = vpop.permute.xlu1 %1297 }
 0x4c8   : > { %2238 = vmatpush3.bf16.xpose.msra.mxu1 %v1061_v2  ;;  %v1303_v4 = vsel %vm934_vm4, %v1298_v3, 0  ;;  %2239 = vmatprep.mubr.msk.bf16.mxu1 %vm2700_vm3, %v2699_v12 }
 0x4c9   : > { %2262 = vmatpush3.bf16.xpose.msra.mxu0 %v1303_v4  ;;  %2243 = vmatprep.subr.bf16.mxu1 %v2699_v12 }
 0x4ca   : > { %2273 = vmatprep.subr.bf16.mxu0 %v2699_v12 }
 0x4cb   : > { %v1296_v5 = vpop.permute.xlu1 %1295 }
 0x4cf   : > { %2240 = vmatmul.mubr.msk.bf16.vlgmr.msra.gmra.mrb[8].mxu1 %vm934_vm4, %v1054_v59 }
 0x4d0   : > { %2264 = vmatmul.mubr.msk.bf16.vlgmr.msra.gmra.mrb[8].mxu0 %vm934_vm4, %v1296_v5  ;;  %2245 = vmatprep.mubr.msk.bf16.mxu1 %vm2700_vm3, %v2699_v12 }
 0x4d1   : > { %2277 = vmatprep.mubr.msk.bf16.mxu0 %vm2700_vm3, %v2699_v12 }
 0x597   : > { %v1218_v6 = vpop.f32.mrb[4].mxu0 }
 0x598   : > { %v2253_v7 = vpop.f32.mrb[5].mxu0  ;;  %v1219_v23 = vadd.f32 %v1218_v6, %v3136_v33 }
 0x599   : > { %v1221_v8 = vpop.f32.mrb[6].mxu0 }
 0x59a   : > { %v3172_v9 = vpop.f32.mrb[4].mxu1  ;;  %v2254_v10 = vpop.f32.mrb[7].mxu0  ;;  %v1222_v29 = vadd.f32 %v1221_v8, %v3138_v35  ;;  %v1225_v34 = vsel %vm982_vm5, %v1219_v23, -inf }
 0x59b   : > { %v2235_v11 = vpop.f32.mrb[5].mxu1 }
 0x59c   : > { %v3174_v13 = vpop.f32.mrb[6].mxu1  ;;  %v1228_v37 = vsel %vm982_vm5, %v1222_v29, -inf }
 0x59d   : > { %v2236_v14 = vpop.f32.mrb[7].mxu1 }
 0x5a2   : > { %v1097_v15 = vpop.f32.mrb[8].mxu1 }
 0x5a3   : > { %v1098_v16 = vadd.f32 %v1097_v15, %v3136_v33  ;;  %v2241_v17 = vpop.f32.mrb[9].mxu1  ;;  %v1339_v18 = vpop.f32.mrb[8].mxu0 }
 0x5a4   : > { %v1100_v19 = vpop.f32.mrb[10].mxu1  ;;  %v2265_v22 = vpop.f32.mrb[9].mxu0  ;;  %v1340_v32 = vadd.f32 %v1339_v18, %v3136_v33 }
 0x5a5   : > { %v1101_v24 = vadd.f32 %v1100_v19, %v3138_v35  ;;  %v2242_v25 = vpop.f32.mrb[11].mxu1  ;;  %v1342_v26 = vpop.f32.mrb[10].mxu0  ;;  %v1104_v27 = vsel %vm982_vm5, %v1098_v16, -inf }
 0x5a6   : > { %1105 = vmax.xlane.f32.xlu1 %v1104_v27  ;;  %v2266_v28 = vpop.f32.mrb[11].mxu0  ;;  %v1343_v36 = vadd.f32 %v1342_v26, %v3138_v35  ;;  %v1346_v38 = vsel %vm982_vm5, %v1340_v32, -inf }
 0x5a7   : > { %v1107_v31 = vsel %vm982_vm5, %v1101_v24, -inf }
 0x5a8   : > { %1108 = vmax.xlane.f32.xlu0 %v1107_v31  ;;  %v1349_v39 = vsel %vm982_vm5, %v1343_v36, -inf }
 0x5aa   : > { %1226 = vmax.xlane.f32.xlu1 %v1225_v34 }
 0x5ac   : > { %1229 = vmax.xlane.f32.xlu0 %v1228_v37 }
 0x5ae   : > { %1347 = vmax.xlane.f32.xlu1 %v1346_v38  ;;  %v2435_v38 = vld [vmem:[%s3051_s27] sm:$0xff]  }
 0x5af   : > { %2274 = vmatpush3.bf16.msra.mxu0 %v2435_v38  ;;  %v2448_v38 = vld [vmem:[%s3033_s12 + $0x18] sm:$0xff]  }
 0x5b0   : > { %1350 = vmax.xlane.f32.xlu0 %v1349_v39  ;;  %2275 = vmatprep.subr.bf16.mxu0 %v2699_v12 }
 0x633   : > { %v1106_v40 = vpop.xlane.xlu1 %1105 }
 0x634   : > { %v1110_v45 = vsub.f32 %v1098_v16, %v1106_v40 }
 0x635   : > { %v1109_v41 = vpop.xlane.xlu0 %1108 }
 0x636   : > { %v1111_v42 = vsub.f32 %v1101_v24, %v1109_v41  ;;  %v1112_v52 = vmul.f32 1.442695, %v1110_v45 }
 0x637   : > { %v1227_v43 = vpop.xlane.xlu1 %1226 }
 0x638   : > { %v1231_v44 = vsub.f32 %v1219_v23, %v1227_v43  ;;  %v1114_v48 = vmul.f32 1.442695, %v1111_v42  ;;  %v2436_v43 = vld [vmem:[%s3051_s27 + $0x8] sm:$0xff]  }
 0x639   : > { %v1230_v33 = vpop.xlane.xlu0 %1229  ;;  %2276 = vmatpush3.bf16.msra.mxu0 %v2436_v43 }
 0x63a   : > { %v1233_v46 = vmul.f32 1.442695, %v1231_v44  ;;  %v1232_v47 = vsub.f32 %v1222_v29, %v1230_v33  ;;  %2301 = vmatprep.subr.bf16.mxu0 %v2699_v12 }
 0x63b   : > { %v1348_v35 = vpop.xlane.xlu1 %1347 }
 0x63c   : > { %2461 = vpow2.f32 %v1233_v46  ;;  %v1235_v49 = vmul.f32 1.442695, %v1232_v47  ;;  %v1352_v50 = vsub.f32 %v1340_v32, %v1348_v35 }
 0x63d   : > { %v1351_v51 = vpop.xlane.xlu0 %1350 }
 0x63e   : > { %2463 = vpow2.f32 %v1235_v49  ;;  %v1354_v53 = vmul.f32 1.442695, %v1352_v50  ;;  %v1353_v54 = vsub.f32 %v1343_v36, %v1351_v51 }
 0x63f   : > { %2465 = vpow2.f32 %v1114_v48 }
 0x640   : > { %2467 = vpow2.f32 %v1354_v53  ;;  %v1356_v55 = vmul.f32 1.442695, %v1353_v54 }
 0x641   : > { %2469 = vpow2.f32 %v1112_v52 }
 0x642   : > { %2471 = vpow2.f32 %v1356_v55 }
 0x646   : > { %v2462_v56 = vpop.eup %2461 }
 0x647   : > { %v1237_v57 = vsel %vm982_vm5, %v2462_v56, 0.0 }
 0x648   : > { %v2464_v58 = vpop.eup %2463  ;;  %1238 = vadd.xlane.f32.xlu1 %v1237_v57 }
 0x649   : > { %v2466_v59 = vpop.eup %2465  ;;  %v1240_v60 = vsel %vm982_vm5, %v2464_v58, 0.0 }
 0x64a   : > { %v2468_v61 = vpop.eup %2467  ;;  %1241 = vadd.xlane.f32.xlu0 %v1240_v60  ;;  %v1119_v0 = vsel %vm982_vm5, %v2466_v59, 0.0 }
 0x64b   : > { %v1358_v62 = vsel %vm982_vm5, %v2468_v61, 0.0  ;;  %v2470_v63 = vpop.eup %2469 }
 0x64c   : > { %1359 = vadd.xlane.f32.xlu1 %v1358_v62  ;;  %v2472_v1 = vpop.eup %2471  ;;  %v1116_v2 = vsel %vm982_vm5, %v2470_v63, 0.0 }
 0x64d   : > { %v1361_v3 = vsel %vm982_vm5, %v2472_v1, 0.0 }
 0x64e   : > { %1120 = vadd.xlane.f32.xlu0 %v1119_v0 }
 0x650   : > { %1117 = vadd.xlane.f32.xlu1 %v1116_v2 }
 0x652   : > { %1362 = vadd.xlane.f32.xlu0 %v1361_v3 }
 0x661   : > { %1127 = vrot.lane.b32.xlu1 %v3127_v30, %s2709_s19 }
 0x665   : > { %1369 = vrot.lane.b32.xlu1 %v3127_v30, %s2710_s5 }
 0x668   : > { %1248 = vrot.lane.b32.xlu0 %v3127_v30, %s2711_s9 }
 0x6d5   : > { %v1239_v4 = vpop.xlane.xlu1 %1238 }
 0x6d7   : > { %v1242_v5 = vpop.xlane.xlu0 %1241 }
 0x6d9   : > { %v1360_v6 = vpop.xlane.xlu1 %1359 }
 0x6db   : > { %v1121_v7 = vpop.xlane.xlu0 %1120 }
 0x6dc   : > { %2473 = vrcp.f32 %v1121_v7 }
 0x6dd   : > { %v1118_v8 = vpop.xlane.xlu1 %1117 }
 0x6de   : > { %2475 = vrcp.f32 %v1118_v8 }
 0x6df   : > { %2477 = vrcp.f32 %v1242_v5  ;;  %v1363_v14 = vpop.xlane.xlu0 %1362 }
 0x6e0   : > { %2479 = vrcp.f32 %v1239_v4 }
 0x6e1   : > { %v1128_v10 = vpop.permute.xlu1 %1127  ;;  %2481 = vrcp.f32 %v1363_v14 }
 0x6e2   : > { %2244 = vmatpush3.bf16.msra.mxu1 %v1128_v10  ;;  %2483 = vrcp.f32 %v1360_v6  ;;  %v2437_v10 = vld [vmem:[%s3031_s22] sm:$0xff]  }
 0x6e3   : > { %2255 = vmatprep.subr.bf16.mxu1 %v2699_v12  ;;  %v1249_v19 = vpop.permute.xlu0 %1248 }
 0x6e5   : > { %v1370_v27 = vpop.permute.xlu1 %1369 }
 0x6e6   : > { %v2474_v11 = vpop.eup %2473 }
 0x6e7   : > { %v1125_v16 = vmul.f32 %v2474_v11, %v2466_v59  ;;  %v813_v11 = vlaneseq }
 0x6e8   : > { %v2476_v15 = vpop.eup %2475 }
 0x6e9   : > { %v1124_v17 = vmul.f32 %v2476_v15, %v2470_v63  ;;  %v2478_v18 = vpop.eup %2477  ;;  %v814_v14 = vand.u32 127, %v813_v11 }
 0x6ea   : > { %v2480_v22 = vpop.eup %2479  ;;  %v1246_v23 = vmul.f32 %v2478_v18, %v2464_v58 }
 0x6eb   : > { %v1126_v30 = vpack.c.bf16 %v1125_v16, %v1124_v17  ;;  %v1245_v24 = vmul.f32 %v2480_v22, %v2462_v56  ;;  %v2482_v26 = vpop.eup %2481  ;;  %vm815_vm8 = vcmp.lt.s32.totalorder %v814_v14, 32 }
 0x6ec   : > { %v2484_v28 = vpop.eup %2483  ;;  %v1367_v29 = vmul.f32 %v2482_v26, %v2472_v1  ;;  %v2439_v26 = vld [vmem:[%s3031_s22 + $0x10] sm:$0xff]  }
 0x6ed   : > { %2246 = vmatmul.mubr.msk.bf16.vlgmr.msra.gmra.mrb[12].mxu1 %vm982_vm5, %v1126_v30  ;;  %v1247_v25 = vpack.c.bf16 %v1246_v23, %v1245_v24  ;;  %v1366_v31 = vmul.f32 %v2484_v28, %v2468_v61  ;;  %v3232_v30 = vsel %vm815_vm8, 1.0, %v2699_v12  ;;  %v2441_v28 = vld [vmem:[%s3031_s22 + $0x20] sm:$0xff]  }
 0x6ee   : > { %2256 = vmatpush3.bf16.msra.mxu1 %v1249_v19  ;;  %2257 = vmatprep.mubr.msk.bf16.mxu1 %vm2700_vm3, %v2699_v12 }
 0x6ef   : > { %2267 = vmatprep.subr.bf16.mxu1 %v2699_v12  ;;  %v1368_v32 = vpack.c.bf16 %v1367_v29, %v1366_v31  ;;  %v2442_v29 = vld [vmem:[%s3031_s22 + $0x28] sm:$0xff]   ;;  %v2443_v31 = vld [vmem:[%s3031_s22 + $0x30] sm:$0xff]  }
 0x6f5   : > { %2258 = vmatmul.mubr.msk.bf16.vlgmr.msra.gmra.mrb[16].mxu1 %vm982_vm5, %v1247_v25  ;;  %v2438_v25 = vld [vmem:[%s3031_s22 + $0x8] sm:$0xff]  }
 0x6f6   : > { %2268 = vmatpush3.bf16.msra.mxu1 %v1370_v27  ;;  %2269 = vmatprep.mubr.msk.bf16.mxu1 %vm2700_vm3, %v2699_v12  ;;  %v2440_v27 = vld [vmem:[%s3031_s22 + $0x18] sm:$0xff]  }
 0x6f7   : > { %2281 = vmatprep.subr.bf16.mxu1 %v2699_v12 }
 0x6fd   : > { %2270 = vmatmul.mubr.msk.bf16.vlgmr.msra.gmra.mrb[20].mxu1 %vm982_vm5, %v1368_v32  ;;  %v2444_v32 = vld [vmem:[%s3031_s22 + $0x38] sm:$0xff]  }
 0x6fe   : > { %2297 = vmatprep.mubr.msk.bf16.mxu1 %vm2700_vm3, %v2699_v12  ;;  %2282 = vmatpush3.bf16.msra.mxu1 %v2437_v10 }
 0x6ff   : > { %2283 = vmatprep.subr.bf16.mxu1 %v2699_v12 }
 0x702   : > { %2284 = vmatpush3.bf16.msra.mxu1 %v2438_v25 }
 0x703   : > { %2285 = vmatprep.subr.bf16.mxu1 %v2699_v12 }
 0x706   : > { %2286 = vmatpush3.bf16.msra.mxu1 %v2439_v26 }
 0x707   : > { %2287 = vmatprep.subr.bf16.mxu1 %v2699_v12 }
 0x70a   : > { %2288 = vmatpush3.bf16.msra.mxu1 %v2440_v27 }
 0x70b   : > { %2289 = vmatprep.subr.bf16.mxu1 %v2699_v12 }
 0x70e   : > { %2290 = vmatpush3.bf16.msra.mxu1 %v2441_v28 }
 0x70f   : > { %2291 = vmatprep.subr.bf16.mxu1 %v2699_v12 }
 0x712   : > { %2292 = vmatpush3.bf16.msra.mxu1 %v2442_v29 }
 0x713   : > { %2293 = vmatprep.subr.bf16.mxu1 %v2699_v12 }
 0x716   : > { %2294 = vmatpush3.bf16.msra.mxu1 %v2443_v31  ;;  %v2146_v31 = vld [vmem:[%s775_s1] ss:$0 sm:$0xff] }
 0x717   : > { %2295 = vmatprep.subr.bf16.mxu1 %v2699_v12 }
 0x71a   : > { %2296 = vmatpush3.bf16.msra.mxu1 %v2444_v32 }
 0x7c0   : > { %v1167_v34 = vpop.f32.mrb[12].mxu1 }
 0x7c1   : > { %v2247_v36 = vpop.f32.mrb[13].mxu1 }
 0x7c2   : > { %v1170_v37 = vpop.f32.mrb[14].mxu1  ;;  %v2446_v36 = vld [vmem:[%s3033_s12 + $0x8] sm:$0xff]  }
 0x7c3   : > { %v2412_v39 = vpack.i.bf16 %v1170_v37, %v1167_v34  ;;  %v2248_v40 = vpop.f32.mrb[15].mxu1  ;;  %v2445_v34 = vld [vmem:[%s3033_s12] sm:$0xff]   ;;  %v2447_v37 = vld [vmem:[%s3033_s12 + $0x10] sm:$0xff]  }
 0x7c4   : > { %v2450_v40 = vld [vmem:[%s3033_s12 + $0x28] sm:$0xff]  }
 0x7c5   : > { %2413 = vrot.lane.b32.xlu1 %v2412_v39, %s2712_s26  ;;  %v2449_v39 = vld [vmem:[%s3033_s12 + $0x20] sm:$0xff]  }
 0x7c8   : > { %v1288_v41 = vpop.f32.mrb[16].mxu1 }
 0x7c9   : > { %v2259_v42 = vpop.f32.mrb[17].mxu1 }
 0x7ca   : > { %v1291_v44 = vpop.f32.mrb[18].mxu1 }
 0x7cb   : > { %v2417_v33 = vpack.i.bf16 %v1291_v44, %v1288_v41  ;;  %v2260_v45 = vpop.f32.mrb[19].mxu1 }
 0x7cd   : > { %2418 = vrot.lane.b32.xlu0 %v2417_v33, %s2713_s10 }
 0x7d0   : > { %v1409_v46 = vpop.f32.mrb[20].mxu1 }
 0x7d1   : > { %v2271_v47 = vpop.f32.mrb[21].mxu1 }
 0x7d2   : > { %v1412_v48 = vpop.f32.mrb[22].mxu1 }
 0x7d3   : > { %v2422_v35 = vpack.i.bf16 %v1412_v48, %v1409_v46  ;;  %v2272_v49 = vpop.f32.mrb[23].mxu1  ;;  %v2126_v48 = vld [vmem:[%s769_s2] ss:$0 sm:$0xff] }
 0x7d5   : > { %2423 = vrot.lane.b32.xlu1 %v2422_v35, %s2714_s29 }
 0x837   : > { %v2414_v50 = vpop.permute.xlu1 %2413 }
 0x838   : > { %v2416_v52 = vunpack.i.h.bf16 %v2414_v50  ;;  %v2415_v53 = vunpack.i.l.bf16 %v2414_v50 }
 0x83a   : > { %v1441_v57 = vsel %vm934_vm4, %v3174_v13, %v2416_v52  ;;  %v1440_v58 = vsel %vm934_vm4, %v3172_v9, %v2415_v53  ;;  %v2122_v9 = vld [vmem:[%s3425_s0] ss:$0 sm:$0xff] }
 0x83f   : > { %v2419_v51 = vpop.permute.xlu0 %2418 }
 0x840   : > { %v2421_v54 = vunpack.i.h.bf16 %v2419_v51  ;;  %v2420_v55 = vunpack.i.l.bf16 %v2419_v51  ;;  %v2127_v51 = vld [vmem:[%s772_s20] ss:$0 sm:$0xff] }
 0x842   : > { %v1443_v61 = vsel %vm982_vm5, %v1441_v57, %v2421_v54  ;;  %v1442_v62 = vsel %vm982_vm5, %v1440_v58, %v2420_v55  ;;  %v2452_v57 = vld [vmem:[%s3033_s12 + $0x38] sm:$0xff]   ;;  %v2128_v58 = vld [vmem:[%s763_s30] ss:$0 sm:$0xff] }
 0x847   : > { %v2424_v56 = vpop.permute.xlu1 %2423 }
 0x848   : > { %v2426_v59 = vunpack.i.h.bf16 %v2424_v56  ;;  %v2425_v60 = vunpack.i.l.bf16 %v2424_v56  ;;  %v2451_v56 = vld [vmem:[%s3033_s12 + $0x30] sm:$0xff]  }
 0x84a   : > { %v1446_v63 = vsel %vm1444_vm6, %v1443_v61, %v2426_v59  ;;  %v1445_v0 = vsel %vm1444_vm6, %v1442_v62, %v2425_v60 }
 0x84b   : > { %v1447_v1 = vpack.c.bf16 %v1446_v63, %v1445_v0 }
 0x84d   : > { %2278 = vmatmul.mubr.msk.bf16.vlgmr.msra.gmra.mrb[12].mxu0 %vm1471_vm7, %v1447_v1 }
 0x84e   : > { %2317 = vmatprep.mubr.msk.bf16.mxu0 %vm2700_vm3, %v2699_v12  ;;  %2302 = vmatpush3.bf16.msra.mxu0 %v2445_v34 }
 0x84f   : > { %2303 = vmatprep.subr.bf16.mxu0 %v2699_v12 }
 0x852   : > { %2304 = vmatpush3.bf16.msra.mxu0 %v2446_v36  ;;  %v2147_v36 = vld [vmem:[%s778_s14] ss:$0 sm:$0xff]  ;;  %s3431_s14 = sld [smem:[#allocation31_spill]] (!%p2148_p4) }
 0x853   : > { %2305 = vmatprep.subr.bf16.mxu0 %v2699_v12 }
 0x856   : > { %2306 = vmatpush3.bf16.msra.mxu0 %v2447_v37 }
 0x857   : > { %2307 = vmatprep.subr.bf16.mxu0 %v2699_v12 }
 0x85a   : > { %2308 = vmatpush3.bf16.msra.mxu0 %v2448_v38 }
 0x85b   : > { %2309 = vmatprep.subr.bf16.mxu0 %v2699_v12 }
 0x85e   : > { %2310 = vmatpush3.bf16.msra.mxu0 %v2449_v39 }
 0x85f   : > { %2311 = vmatprep.subr.bf16.mxu0 %v2699_v12 }
 0x862   : > { %2312 = vmatpush3.bf16.msra.mxu0 %v2450_v40 }
 0x863   : > { %2313 = vmatprep.subr.bf16.mxu0 %v2699_v12 }
 0x866   : > { %2314 = vmatpush3.bf16.msra.mxu0 %v2451_v56 }
 0x867   : > { %2315 = vmatprep.subr.bf16.mxu0 %v2699_v12  ;;  %v2137_v12 = vld [vmem:[%s766_s11] ss:$0 sm:$0xff] }
 0x86a   : > { %2316 = vmatpush3.bf16.msra.mxu0 %v2452_v57 }
 0x920   : > { %v1509_v13 = vpop.f32.mrb[12].mxu0 }
 0x921   : > { %v1510_v2 = vadd.f32 %v2122_v9, %v1509_v13  ;;  %v2279_v3 = vpop.f32.mrb[13].mxu0 }
 0x922   : > { %v1512_v4 = vpop.f32.mrb[14].mxu0 }
 0x923   : > { %v1513_v5 = vadd.f32 %v2122_v9, %v1512_v4  ;;  %v2280_v6 = vpop.f32.mrb[15].mxu0  ;;  %v1516_v7 = vadd.f32 %v1510_v2, %v3112_v20 }
 0x925   : > { %1520 = vadd.xlane.f32.xlu0 %v1516_v7  ;;  %v1517_v8 = vadd.f32 %v1513_v5, %v3114_v21 }
 0x927   : > { %1522 = vadd.xlane.f32.xlu1 %v1517_v8 }
 0x9b2   : > { %v1521_v15 = vpop.xlane.xlu0 %1520 }
 0x9b3   : > { %v1524_v16 = vmul.f32 0.03125, %v1521_v15 }
 0x9b4   : > { %v1523_v17 = vpop.xlane.xlu1 %1522 }
 0x9b5   : > { %v1526_v20 = vsub.f32 %v1516_v7, %v1524_v16  ;;  %v1525_v18 = vmul.f32 0.03125, %v1523_v17 }
 0x9b7   : > { %v1527_v21 = vsub.f32 %v1517_v8, %v1525_v18  ;;  %v1528_v19 = vmul.f32 %v3232_v30, %v1526_v20 }
 0x9b9   : > { %v1530_v22 = vmul.f32 %v1528_v19, %v1528_v19  ;;  %v1529_v23 = vmul.f32 %v3232_v30, %v1527_v21 }
 0x9bb   : > { %1532 = vadd.xlane.f32.xlu0 %v1530_v22  ;;  %v1531_v24 = vmul.f32 %v1529_v23, %v1529_v23 }
 0x9bf   : > { %1534 = vadd.xlane.f32.xlu0 %v1531_v24 }
 0xa48   : > { %v1533_v41 = vpop.xlane.xlu0 %1532 }
 0xa49   : > { %v1536_v42 = vmul.f32 0.03125, %v1533_v41 }
 0xa4b   : > { %v1538_v43 = vadd.f32 1e-05, %v1536_v42 }
 0xa4c   : > { %v1535_v44 = vpop.xlane.xlu0 %1534 }
 0xa4d   : > { %2485 = vrsqrt.f32 %v1538_v43  ;;  %v1537_v33 = vmul.f32 0.03125, %v1535_v44 }
 0xa4f   : > { %v1539_v45 = vadd.f32 1e-05, %v1537_v33 }
 0xa51   : > { %2487 = vrsqrt.f32 %v1539_v45 }
 0xa57   : > { %v2486_v46 = vpop.eup %2485 }
 0xa58   : > { %v1542_v47 = vmul.f32 %v2486_v46, %v1528_v19 }
 0xa5a   : > { %v1550_v50 = vmul.f32 %v2126_v48, %v1542_v47 }
 0xa5b   : > { %v2488_v35 = vpop.eup %2487 }
 0xa5c   : > { %v1543_v49 = vmul.f32 %v2488_v35, %v1529_v23  ;;  %v1558_v53 = vadd.f32 %v2127_v51, %v1550_v50 }
 0xa5e   : > { %v1551_v52 = vmul.f32 %v2126_v48, %v1543_v49 }
 0xa60   : > { %v1559_v54 = vadd.f32 %v2127_v51, %v1551_v52 }
 0xa62   : > { %v1560_v55 = vpack.c.bf16 %v1559_v54, %v1558_v53 }
 0xa64   : > { %2298 = vmatmul.mubr.bf16.vlgmr.msra.gmra.mrb[24].mxu1 %v1560_v55 }
 0xb37   : > { %v1666_v59 = vpop.f32.mrb[24].mxu1 }
 0xb38   : > { %v1667_v60 = vadd.f32 %v2128_v58, %v1666_v59  ;;  %v2299_v61 = vpop.f32.mrb[25].mxu1  ;;  %v2149_v59 = vld [vmem:[%s3431_s14] ss:$0 sm:$0xff] (!%p2148_p4) }
 0xb39   : > { %v1669_v62 = vpop.f32.mrb[26].mxu1 }
 0xb3a   : > { %v1670_v63 = vadd.f32 %v2128_v58, %v1669_v62  ;;  %v2300_v0 = vpop.f32.mrb[27].mxu1  ;;  %v1673_v1 = vmax.f32 %v1667_v60, 0.0 }
 0xb3c   : > { %v1674_v9 = vmax.f32 %v1670_v63, 0.0 }
 0xb3e   : > { %v1675_v13 = vpack.c.bf16 %v1674_v9, %v1673_v1 }
 0xb40   : > { %2318 = vmatmul.mubr.bf16.vlgmr.msra.gmra.mrb[16].mxu0 %v1675_v13 }
 0xc13   : > { %v1781_v2 = vpop.f32.mrb[16].mxu0 }
 0xc14   : > { %v1782_v3 = vadd.f32 %v2137_v12, %v1781_v2  ;;  %v2319_v4 = vpop.f32.mrb[17].mxu0 }
 0xc15   : > { %v1784_v5 = vpop.f32.mrb[18].mxu0 }
 0xc16   : > { %v1785_v6 = vadd.f32 %v2137_v12, %v1784_v5  ;;  %v2320_v7 = vpop.f32.mrb[19].mxu0  ;;  %v1788_v8 = vadd.f32 %v1782_v3, %v1558_v53 }
 0xc18   : > { %1792 = vadd.xlane.f32.xlu1 %v1788_v8  ;;  %v1789_v10 = vadd.f32 %v1785_v6, %v1559_v54 }
 0xc1a   : > { %1794 = vadd.xlane.f32.xlu0 %v1789_v10 }
 0xca5   : > { %v1793_v11 = vpop.xlane.xlu1 %1792 }
 0xca6   : > { %v1796_v14 = vmul.f32 0.03125, %v1793_v11 }
 0xca7   : > { %v1795_v15 = vpop.xlane.xlu0 %1794 }
 0xca8   : > { %v1798_v16 = vsub.f32 %v1788_v8, %v1796_v14  ;;  %v1797_v17 = vmul.f32 0.03125, %v1795_v15 }
 0xcaa   : > { %v1799_v20 = vsub.f32 %v1789_v10, %v1797_v17  ;;  %v1800_v18 = vmul.f32 %v3232_v30, %v1798_v16 }
 0xcac   : > { %v1802_v21 = vmul.f32 %v1800_v18, %v1800_v18  ;;  %v1801_v19 = vmul.f32 %v3232_v30, %v1799_v20 }
 0xcae   : > { %1804 = vadd.xlane.f32.xlu1 %v1802_v21  ;;  %v1803_v22 = vmul.f32 %v1801_v19, %v1801_v19 }
 0xcb0   : > { %1806 = vadd.xlane.f32.xlu0 %v1803_v22 }
 0xd3b   : > { %v1805_v23 = vpop.xlane.xlu1 %1804 }
 0xd3c   : > { %v1808_v24 = vmul.f32 0.03125, %v1805_v23 }
 0xd3d   : > { %v1807_v25 = vpop.xlane.xlu0 %1806 }
 0xd3e   : > { %v1810_v26 = vadd.f32 1e-05, %v1808_v24  ;;  %v1809_v27 = vmul.f32 0.03125, %v1807_v25 }
 0xd40   : > { %2489 = vrsqrt.f32 %v1810_v26  ;;  %v1811_v28 = vadd.f32 1e-05, %v1809_v27 }
 0xd42   : > { %2491 = vrsqrt.f32 %v1811_v28 }
 0xd4a   : > { %v2490_v29 = vpop.eup %2489 }
 0xd4b   : > { %v1814_v32 = vmul.f32 %v2490_v29, %v1800_v18 }
 0xd4c   : > { %v2492_v34 = vpop.eup %2491 }
 0xd4d   : > { %v1822_v37 = vmul.f32 %v2146_v31, %v1814_v32  ;;  %v1815_v38 = vmul.f32 %v2492_v34, %v1801_v19  ;;  %1837 = sbr.rel (%p2148_p4) target bundleno = 3735 (0xe97), region = 112 }
 0xd4f   : > { %v1830_v39 = vadd.f32 %v2147_v36, %v1822_v37  ;;  %v1823_v40 = vmul.f32 %v2146_v31, %v1815_v38 }
 0xd51   : > { %1832 = vst [vmem:[#allocation11] sm:$0xff] %v1830_v39  ;;  %v1831_v41 = vadd.f32 %v2147_v36, %v1823_v40 }
 0xd53   : > { %1833 = vst [vmem:[#allocation11 + $0x8] sm:$0xff] %v1831_v41 }
 0xd58   : > { %v1838_v42 = vld [vmem:[#allocation11] sm:$0xff] }
 0xd59   : > { %1842 = vadd.xlane.f32.xlu0 %v1838_v42 }
 0xd5a   : > { %v1839_v43 = vld [vmem:[#allocation11 + $0x8] sm:$0xff] }
 0xd5d   : > { %1844 = vadd.xlane.f32.xlu0 %v1839_v43 }
 0xde6   : > { %v1843_v44 = vpop.xlane.xlu0 %1842 }
 0xde7   : > { %v1846_v33 = vmul.f32 0.03125, %v1843_v44 }
 0xde9   : > { %v1848_v45 = vsub.f32 %v1838_v42, %v1846_v33 }
 0xdea   : > { %v1845_v46 = vpop.xlane.xlu0 %1844 }
 0xdeb   : > { %v1847_v47 = vmul.f32 0.03125, %v1845_v46  ;;  %v1850_v48 = vmul.f32 %v3232_v30, %v1848_v45 }
 0xded   : > { %v1849_v35 = vsub.f32 %v1839_v43, %v1847_v47  ;;  %v1852_v49 = vmul.f32 %v1850_v48, %v1850_v48 }
 0xdef   : > { %v1851_v50 = vmul.f32 %v3232_v30, %v1849_v35  ;;  %1854 = vadd.xlane.f32.xlu1 %v1852_v49  ;;  %v2150_v30 = vld [vmem:[%s3432_s15] ss:$0 sm:$0xff] }
 0xdf1   : > { %v1853_v51 = vmul.f32 %v1851_v50, %v1851_v50 }
 0xdf3   : > { %1856 = vadd.xlane.f32.xlu1 %v1853_v51 }
 0xe7c   : > { %v1855_v52 = vpop.xlane.xlu1 %1854 }
 0xe7d   : > { %v1858_v53 = vmul.f32 0.03125, %v1855_v52 }
 0xe7f   : > { %v1860_v54 = vadd.f32 1e-05, %v1858_v53 }
 0xe80   : > { %v1857_v55 = vpop.xlane.xlu1 %1856 }
 0xe81   : > { %2493 = vrsqrt.f32 %v1860_v54  ;;  %v1859_v56 = vmul.f32 0.03125, %v1857_v55 }
 0xe83   : > { %v1861_v57 = vadd.f32 1e-05, %v1859_v56 }
 0xe85   : > { %2495 = vrsqrt.f32 %v1861_v57 }
 0xe8b   : > { %v2494_v58 = vpop.eup %2493 }
 0xe8c   : > { %v1864_v60 = vmul.f32 %v2494_v58, %v1850_v48 }
 0xe8e   : > { %v1872_v61 = vmul.f32 %v2149_v59, %v1864_v60 }
 0xe8f   : > { %v2496_v62 = vpop.eup %2495 }
 0xe90   : > { %v1880_v63 = vadd.f32 %v2150_v30, %v1872_v61  ;;  %v1865_v0 = vmul.f32 %v2496_v62, %v1851_v50 }
 0xe92   : > { %1882 = vst [vmem:[#allocation11] sm:$0xff] %v1880_v63  ;;  %v1873_v1 = vmul.f32 %v2149_v59, %v1865_v0 }
 0xe94   : > { %v1881_v9 = vadd.f32 %v2150_v30, %v1873_v1 }
 0xe96   : > { %1883 = vst [vmem:[#allocation11 + $0x8] sm:$0xff] %v1881_v9 }
 0xe97 PF: > { %p2352_p1 = scmp.eq.s32.totalorder %s2896_s28, 1  ;;  %s2715_s0 = smov [#allocation11]  }
 0xe98   : > { %s1890_s22 = sshll.u32 %s2715_s0, 4  ;;  %s1891_s22 = int_to_ptr.vmem [resolvable:$true] %s1890_s22 }
 0xe99   : > { %s2615_s17 = scalar_lea.vmem %s1891_s22, 256  ;;  %p2622_p3 = scmp.lt.s32.totalorder %s1891_s22, %s1891_s22 }
 0xe9a   : > { %p2616_p2 = scmp.ne.s32.totalorder %s1891_s22, %s2615_s17  ;;  %p2623_p11 = scmp.lt.s32.totalorder %s2615_s17, %s2615_s17 }
 0xe9c   : > { %p2617_p7 = pnand %p2616_p2, %p2352_p1  ;;  %p2624_p12 = por %p2623_p11, %p2622_p3 }
 0xe9e   : > { %p2618_p9 = pneg %p2617_p7 }
 0xea0   : > { %p2625_p8 = pnand %p2624_p12, %p2618_p9 }
 0xea2   : > { %2628 = shalt.err (!%p2625_p8)
}
 0xea3   : > { %s3433_s13 = sld [smem:[#allocation33_spill]] }
 0xea9   : > { %s2629_s21 = scalar_lea.hbm %s3433_s13, 256 }
 0xeaa   : > { %p2630_p10 = scmp.ne.s32.totalorder %s3433_s13, %s2629_s21  ;;  %p2635_p5 = scmp.lt.u32.totalorder %s2629_s21, %s3433_s13 }
 0xeac   : > { %p2631_p6 = pnand %p2630_p10, %p2352_p1 }
 0xeae   : > { %p2632_p13 = pneg %p2631_p6 }
 0xeb0   : > { %p2637_p0 = pnand %p2635_p5, %p2632_p13 }
 0xeb2   : > { %2640 = shalt.err (!%p2637_p0)
}
 0xeb3   : > { %s2716_s19 = smov 128  }
 0xeb4   : > { %2332 = dma.vmem_to_hbm [thread:$0]  (%p2352_p1), %s1891_s22, 256, %s3433_s13, [#allocation5], %s2716_s19, %s2716_s19, %s2712_s26  }
 0xeb5   : > { %2670 = dma.done.wait (%p2352_p1), [#allocation5], 256  }
 0xeb6   : > { %2672 = vsyncadd (%p2352_p1), [#allocation5], 4294967040 }
 0xeb7 PF: > { %s3434_s27 = sld [smem:[#allocation17_spill]]  ;;  %s3435_s11 = sld [smem:[#allocation16_spill]] }
 0xeb8   : > { %s3436_s26 = sld [smem:[#allocation18_spill]]  ;;  %s3437_s24 = smov %s2679_s25 }
 0xebd   : > { %p32_p4 = scmp.ge.s32.totalorder %s3434_s27, 4   ;;  %s3438_s25 = smov %s3435_s11 }
 0xebf   :  { %34 = sbr.rel (!%p32_p4) target bundleno = 23 (0x17), region = 189 }
 0xec6   :  { %1906 = vsyncpa [#allocation4], 1 }
 0xec7   :  { %1908 = vsyncpa [#allocation4 + $0x1], 1 }
 0xec8   :  { %1909 = vsyncpa [#allocation7], 1 }
 0xec9   :  { %1911 = vsyncpa [#allocation7 + $0x1], 1 }
 0xeca   :  { %1912 = vsyncpa [#allocation10], 1 }
 0xecb   :  { %1914 = vsyncpa [#allocation10 + $0x1], 1 }
 0xecc   :  { %1915 = vsyncpa [#allocation5], 1 }
 0xecd   :  { %1917 = vsyncpa [#allocation5 + $0x1], 1 }

</bundles_post_ra>
